<compile_context>
chip_gen: v6e
topology: v6e:2x2x1
jax: 0.10.0
libtpu: 0.0.40
codegen_flags: <defaults>
</compile_context>

<pallas_src>
import math

import jax
import jax.numpy as jnp
import numpy as np
from jax import lax
from jax.experimental import pallas as pl
from jax.experimental.pallas import tpu as pltpu

# ----------------------------- config (small) -----------------------------
B = 2            # batch
S = 8            # sequence length
H = 32           # hidden size
NUM_HEADS = 4
HEAD_DIM = H // NUM_HEADS
INTER = 64       # intermediate size
NUM_LAYERS = 2
LN_EPS = 1e-12


# ------------------------------ Pallas kernel ------------------------------
def _layer_norm(y, g, b):
    mu = jnp.mean(y, axis=-1, keepdims=True)
    var = jnp.mean((y - mu) * (y - mu), axis=-1, keepdims=True)
    return (y - mu) * lax.rsqrt(var + LN_EPS) * g + b


def bert_layer_kernel(x_ref, mask_ref,
                      wq_ref, wk_ref, wv_ref, bq_ref, bk_ref, bv_ref,
                      wo_ref, wi_ref, wo2_ref, bi_ref, vec_ref,
                      out_ref, h_ref):
    layer = pl.program_id(1)

    # Load the input block into the resident hidden-state scratch at layer 0.
    @pl.when(layer == 0)
    def _():
        h_ref[...] = x_ref[0]

    h = h_ref[...]                          # (S, H) f32, resident across layers
    h_bf = h.astype(jnp.bfloat16)           # bf16 MXU operands, f32 accumulation
    add_mask = mask_ref[0]                  # (1, S) additive attention mask, f32
    vecs = vec_ref[0]                       # (6, H): [bo, ln1g, ln1b, bo2, ln2g, ln2b]

    # --- BertSelfAttention (head-major weights; merge folded into output proj) ---
    attn = jnp.zeros((S, H), jnp.float32)
    for n in range(NUM_HEADS):              # small static unroll over heads
        q = jnp.dot(h_bf, wq_ref[0, n], preferred_element_type=jnp.float32) + bq_ref[0, n]
        k = jnp.dot(h_bf, wk_ref[0, n], preferred_element_type=jnp.float32) + bk_ref[0, n]
        v = jnp.dot(h_bf, wv_ref[0, n], preferred_element_type=jnp.float32) + bv_ref[0, n]

        # scores = q @ k.T (scale already folded into Wq/bq), additive mask, softmax
        s = lax.dot_general(q.astype(jnp.bfloat16), k.astype(jnp.bfloat16),
                            (((1,), (1,)), ((), ())),
                            preferred_element_type=jnp.float32) + add_mask   # (S, S)
        m = jnp.max(s, axis=-1, keepdims=True)
        p = jnp.exp(s - m)
        denom = jnp.sum(p, axis=-1, keepdims=True)

        ctx = jnp.dot(p.astype(jnp.bfloat16), v.astype(jnp.bfloat16),
                      preferred_element_type=jnp.float32)                    # (S, d)
        ctx = ctx * pl.reciprocal(denom, approx=True)   # EUP slot; head_mask folded into Wv/bv
        attn = attn + jnp.dot(ctx.astype(jnp.bfloat16), wo_ref[0, n],
                              preferred_element_type=jnp.float32)            # (S, H)

    # --- BertSelfOutput: bias + residual + LayerNorm ---
    attn = _layer_norm(attn + vecs[0:1, :] + h, vecs[1:2, :], vecs[2:3, :])

    # --- BertIntermediate: dense + erf-GELU ---
    inter = jnp.dot(attn.astype(jnp.bfloat16), wi_ref[0],
                    preferred_element_type=jnp.float32) + bi_ref[0]
    inter = inter * 0.5 * (1.0 + lax.erf(inter * (1.0 / math.sqrt(2.0))))

    # --- BertOutput: dense + residual + LayerNorm ---
    out = jnp.dot(inter.astype(jnp.bfloat16), wo2_ref[0],
                  preferred_element_type=jnp.float32) + vecs[3:4, :]
    h_new = _layer_norm(out + attn, vecs[4:5, :], vecs[5:6, :])

    h_ref[...] = h_new                      # carry to next layer (grid step)

    @pl.when(layer == pl.num_programs(1) - 1)
    def _():
        out_ref[0] = h_new                  # single HBM writeback per batch block


@jax.jit
def bert_encoder_pallas(hidden_states, attn_mask, head_mask, packed):
    # Layout plumbing in the wrapper (not compute): squeeze mask, fold head_mask
    # into the V weights/bias (exact: probs_h * hm == probs_h @ (hm * V_h)).
    mask_b = attn_mask.reshape(B, 1, S)
    hm = head_mask[:, :, None, None]                              # (L, NH, 1, 1)
    wv_eff = (packed["wv"].astype(jnp.float32) * hm).astype(jnp.bfloat16)
    bv_eff = packed["bv"] * hm

    args = (hidden_states, mask_b,
            packed["wq"], packed["wk"], wv_eff,
            packed["bq"], packed["bk"], bv_eff,
            packed["wo"], packed["wi"], packed["wo2"],
            packed["bi"], packed["vecs"])

    grid_spec = pltpu.PrefetchScalarGridSpec(
        num_scalar_prefetch=0,
        grid=(B, NUM_LAYERS),                       # (parallel batch, arbitrary layer)
        in_specs=[
            pl.BlockSpec((1, S, H), lambda b, l: (b, 0, 0)),                       # x
            pl.BlockSpec((1, 1, S), lambda b, l: (b, 0, 0)),                       # mask
            pl.BlockSpec((1, NUM_HEADS, H, HEAD_DIM), lambda b, l: (l, 0, 0, 0)),  # wq
            pl.BlockSpec((1, NUM_HEADS, H, HEAD_DIM), lambda b, l: (l, 0, 0, 0)),  # wk
            pl.BlockSpec((1, NUM_HEADS, H, HEAD_DIM), lambda b, l: (l, 0, 0, 0)),  # wv
            pl.BlockSpec((1, NUM_HEADS, 1, HEAD_DIM), lambda b, l: (l, 0, 0, 0)),  # bq
            pl.BlockSpec((1, NUM_HEADS, 1, HEAD_DIM), lambda b, l: (l, 0, 0, 0)),  # bk
            pl.BlockSpec((1, NUM_HEADS, 1, HEAD_DIM), lambda b, l: (l, 0, 0, 0)),  # bv
            pl.BlockSpec((1, NUM_HEADS, HEAD_DIM, H), lambda b, l: (l, 0, 0, 0)),  # wo
            pl.BlockSpec((1, H, INTER), lambda b, l: (l, 0, 0)),                   # wi
            pl.BlockSpec((1, INTER, H), lambda b, l: (l, 0, 0)),                   # wo2
            pl.BlockSpec((1, 1, INTER), lambda b, l: (l, 0, 0)),                   # bi
            pl.BlockSpec((1, 6, H), lambda b, l: (l, 0, 0)),                       # vecs
        ],
        out_specs=pl.BlockSpec((1, S, H), lambda b, l: (b, 0, 0)),
        scratch_shapes=[pltpu.VMEM((S, H), jnp.float32)],          # resident hidden state
    )

    out = pl.pallas_call(
        bert_layer_kernel,
        out_shape=jax.ShapeDtypeStruct((B, S, H), jnp.float32),
        grid_spec=grid_spec,
        compiler_params=pltpu.CompilerParams(
            dimension_semantics=("parallel", "arbitrary")),
    )(*args)
    return out


# ---------------------------- pure-JAX reference ----------------------------
def _gelu_ref(x):
    return x * 0.5 * (1.0 + lax.erf(x / math.sqrt(2.0)))


def _ln_ref(y, g, b):
    mu = jnp.mean(y, axis=-1, keepdims=True)
    var = jnp.mean((y - mu) ** 2, axis=-1, keepdims=True)
    return (y - mu) / jnp.sqrt(var + LN_EPS) * g + b


def bert_encoder_ref(x, attn_mask, head_mask, params):
    for i, p in enumerate(params):
        q = x @ p["wq"] + p["bq"]
        k = x @ p["wk"] + p["bk"]
        v = x @ p["wv"] + p["bv"]

        def split(t):  # (B,S,H) -> (B,heads,S,d)
            return t.reshape(B, S, NUM_HEADS, HEAD_DIM).transpose(0, 2, 1, 3)

        qh, kh, vh = split(q), split(k), split(v)
        scores = jnp.einsum("bhqd,bhkd->bhqk", qh, kh) / math.sqrt(HEAD_DIM)
        scores = scores + attn_mask                     # (B,1,1,S) broadcast
        probs = jax.nn.softmax(scores, axis=-1)
        probs = probs * head_mask[i][None, :, None, None]
        ctx = jnp.einsum("bhqk,bhkd->bhqd", probs, vh)
        ctx = ctx.transpose(0, 2, 1, 3).reshape(B, S, H)

        attn_out = _ln_ref(ctx @ p["wo"] + p["bo"] + x, p["ln1g"], p["ln1b"])
        inter = _gelu_ref(attn_out @ p["wi"] + p["bi"])
        x = _ln_ref(inter @ p["wo2"] + p["bo2"] + attn_out, p["ln2g"], p["ln2b"])
    return x


# --------------------------- parameter construction ---------------------------
def make_params(key):
    params = []
    for _ in range(NUM_LAYERS):
        keys = jax.random.split(key, 15)
        key = keys[0]

        def lin(kw, kb, n_in, n_out):
            # PyTorch Linear stores (out,in); we store pre-transposed (in,out).
            w = jax.random.normal(kw, (n_in, n_out), jnp.float32) * 0.02
            b = jax.random.normal(kb, (n_out,), jnp.float32) * 0.02
            return w, b

        wq, bq = lin(keys[1], keys[2], H, H)
        wk, bk = lin(keys[3], keys[4], H, H)
        wv, bv = lin(keys[5], keys[6], H, H)
        wo, bo = lin(keys[7], keys[8], H, H)
        wi, bi = lin(keys[9], keys[10], H, INTER)
        wo2, bo2 = lin(keys[11], keys[12], INTER, H)
        ln1g = 1.0 + 0.1 * jax.random.normal(keys[13], (H,), jnp.float32)
        ln2g = 1.0 + 0.1 * jax.random.normal(keys[14], (H,), jnp.float32)
        params.append(dict(
            wq=wq, bq=bq, wk=wk, bk=bk, wv=wv, bv=bv,
            wo=wo, bo=bo,
            ln1g=ln1g, ln1b=jnp.zeros((H,), jnp.float32),
            wi=wi, bi=bi, wo2=wo2, bo2=bo2,
            ln2g=ln2g, ln2b=jnp.zeros((H,), jnp.float32),
        ))
    return params


def pack_params(params):
    """Stack per-layer weights with a leading layer axis; head-major split of the
    attention weights; fold 1/sqrt(d) into Q; matmul weights in bf16."""
    scale = 1.0 / math.sqrt(HEAD_DIM)

    def heads_in(w):   # (H, H) -> (NH, H, d): column block n*d:(n+1)*d is head n
        return w.reshape(H, NUM_HEADS, HEAD_DIM).transpose(1, 0, 2)

    def heads_b(b):    # (H,) -> (NH, 1, d)
        return b.reshape(NUM_HEADS, 1, HEAD_DIM)

    wq = jnp.stack([heads_in(p["wq"]) * scale for p in params]).astype(jnp.bfloat16)
    wk = jnp.stack([heads_in(p["wk"]) for p in params]).astype(jnp.bfloat16)
    wv = jnp.stack([heads_in(p["wv"]) for p in params]).astype(jnp.bfloat16)
    bq = jnp.stack([heads_b(p["bq"]) * scale for p in params])            # f32
    bk = jnp.stack([heads_b(p["bk"]) for p in params])                    # f32
    bv = jnp.stack([heads_b(p["bv"]) for p in params])                    # f32
    # Output projection split head-major along its input rows: (NH, d, H).
    wo = jnp.stack([p["wo"].reshape(NUM_HEADS, HEAD_DIM, H)
                    for p in params]).astype(jnp.bfloat16)
    wi = jnp.stack([p["wi"] for p in params]).astype(jnp.bfloat16)        # (L,H,INTER)
    wo2 = jnp.stack([p["wo2"] for p in params]).astype(jnp.bfloat16)      # (L,INTER,H)
    bi = jnp.stack([p["bi"][None, :] for p in params])                    # (L,1,INTER) f32
    vecs = jnp.stack([jnp.stack([p["bo"], p["ln1g"], p["ln1b"],
                                 p["bo2"], p["ln2g"], p["ln2b"]], axis=0)
                      for p in params])                                   # (L,6,H) f32
    return dict(wq=wq, wk=wk, wv=wv, bq=bq, bk=bk, bv=bv, wo=wo,
                wi=wi, wo2=wo2, bi=bi, vecs=vecs)


# --------------------------------- main ------------------------------------
if __name__ == "__main__":
    key = jax.random.PRNGKey(0)
    k_x, k_p = jax.random.split(key)

    hidden_states = jax.random.normal(k_x, (B, S, H), jnp.float32)

    # Additive attention mask: last 2 tokens of batch 1 are masked out.
    pad = np.zeros((B, 1, 1, S), np.float32)
    pad[1, 0, 0, -2:] = -10000.0
    attn_mask = jnp.asarray(pad)

    # head_mask (num_layers, num_heads): 1 == keep head; prune head 2 of layer 1.
    hm = np.ones((NUM_LAYERS, NUM_HEADS), np.float32)
    hm[1, 2] = 0.0
    head_mask = jnp.asarray(hm)

    params = make_params(k_p)
    packed = pack_params(params)

    out = bert_encoder_pallas(hidden_states, attn_mask, head_mask, packed)
    out = jax.block_until_ready(out)

    # Reference stays f32; kernel uses bf16 MXU operands with f32 accumulation,
    # so compare at a bf16-appropriate tolerance.
    ref = bert_encoder_ref(hidden_states, attn_mask, head_mask, params)
    np.testing.assert_allclose(np.asarray(out), np.asarray(ref),
                               rtol=2e-2, atol=2e-2)

    # TODO(synk): dropout layers are identity (eval mode); output_attentions /
    # output_hidden_states tuple collection is plain-Python glue and omitted here.
    print("KERNEL_OK")
</pallas_src>

<mosaic_0001>
module attributes {stable_mosaic.version = 11 : i64} {
  func.func @bert_layer_kernel(%arg0: i32, %arg1: i32, %arg2: memref<1x8x32xf32, #tpu.memory_space<vmem>>, %arg3: memref<1x1x8xf32, #tpu.memory_space<vmem>>, %arg4: memref<1x4x32x8xbf16, #tpu.memory_space<vmem>>, %arg5: memref<1x4x32x8xbf16, #tpu.memory_space<vmem>>, %arg6: memref<1x4x32x8xbf16, #tpu.memory_space<vmem>>, %arg7: memref<1x4x1x8xf32, #tpu.memory_space<vmem>>, %arg8: memref<1x4x1x8xf32, #tpu.memory_space<vmem>>, %arg9: memref<1x4x1x8xf32, #tpu.memory_space<vmem>>, %arg10: memref<1x4x8x32xbf16, #tpu.memory_space<vmem>>, %arg11: memref<1x32x64xbf16, #tpu.memory_space<vmem>>, %arg12: memref<1x64x32xbf16, #tpu.memory_space<vmem>>, %arg13: memref<1x1x64xf32, #tpu.memory_space<vmem>>, %arg14: memref<1x6x32xf32, #tpu.memory_space<vmem>>, %arg15: memref<1x8x32xf32, #tpu.memory_space<vmem>>, %arg16: memref<8x32xf32, #tpu.memory_space<vmem>>) attributes {dimension_semantics = [#tpu.dimension_semantics<parallel>, #tpu.dimension_semantics<arbitrary>], iteration_bounds = array<i64: 2, 2>, scalar_prefetch = 0 : i64, scratch_operands = 1 : i64, tpu.core_type = #tpu.core_type<tc>, window_params = [{transform_indices = @transform_0, window_bounds = array<i64: 1, 8, 32>}, {transform_indices = @transform_1, window_bounds = array<i64: 1, 1, 8>}, {transform_indices = @transform_2, window_bounds = array<i64: 1, 4, 32, 8>}, {transform_indices = @transform_3, window_bounds = array<i64: 1, 4, 32, 8>}, {transform_indices = @transform_4, window_bounds = array<i64: 1, 4, 32, 8>}, {transform_indices = @transform_5, window_bounds = array<i64: 1, 4, 1, 8>}, {transform_indices = @transform_6, window_bounds = array<i64: 1, 4, 1, 8>}, {transform_indices = @transform_7, window_bounds = array<i64: 1, 4, 1, 8>}, {transform_indices = @transform_8, window_bounds = array<i64: 1, 4, 8, 32>}, {transform_indices = @transform_9, window_bounds = array<i64: 1, 32, 64>}, {transform_indices = @transform_10, window_bounds = array<i64: 1, 64, 32>}, {transform_indices = @transform_11, window_bounds = array<i64: 1, 1, 64>}, {transform_indices = @transform_12, window_bounds = array<i64: 1, 6, 32>}, {transform_indices = @transform_13, window_bounds = array<i64: 1, 8, 32>}]} {
    %c0_i32 = arith.constant 0 : i32
    %0 = arith.cmpi eq, %arg1, %c0_i32 : i32
    %1 = arith.extui %0 : i1 to i32
    %c0_i32_0 = arith.constant 0 : i32
    %2 = arith.cmpi ne, %1, %c0_i32_0 : i32
    scf.if %2 {
      %c0_176 = arith.constant 0 : index
      %c0_177 = arith.constant 0 : index
      %c0_178 = arith.constant 0 : index
      %270 = vector.load %arg2[%c0_176, %c0_177, %c0_178] : memref<1x8x32xf32, #tpu.memory_space<vmem>>, vector<1x8x32xf32>
      %271 = vector.shape_cast %270 : vector<1x8x32xf32> to vector<8x32xf32>
      %c0_179 = arith.constant 0 : index
      %c0_180 = arith.constant 0 : index
      %272 = vector.load %arg16[%c0_179, %c0_180] : memref<8x32xf32, #tpu.memory_space<vmem>>, vector<8x32xf32>
      tpu.vector_store %arg16[%c0_179, %c0_180], %271 {strides = array<i32>} : memref<8x32xf32, #tpu.memory_space<vmem>>, vector<8x32xf32>,
    } else {
    }
    %c0 = arith.constant 0 : index
    %c0_1 = arith.constant 0 : index
    %3 = vector.load %arg16[%c0, %c0_1] : memref<8x32xf32, #tpu.memory_space<vmem>>, vector<8x32xf32>
    %4 = arith.truncf %3 : vector<8x32xf32> to vector<8x32xbf16>
    %c0_2 = arith.constant 0 : index
    %c0_3 = arith.constant 0 : index
    %c0_4 = arith.constant 0 : index
    %5 = vector.load %arg3[%c0_2, %c0_3, %c0_4] : memref<1x1x8xf32, #tpu.memory_space<vmem>>, vector<1x1x8xf32>
    %6 = vector.shape_cast %5 : vector<1x1x8xf32> to vector<1x8xf32>
    %c0_5 = arith.constant 0 : index
    %c0_6 = arith.constant 0 : index
    %c0_7 = arith.constant 0 : index
    %7 = vector.load %arg14[%c0_5, %c0_6, %c0_7] : memref<1x6x32xf32, #tpu.memory_space<vmem>>, vector<1x6x32xf32>
    %8 = vector.shape_cast %7 : vector<1x6x32xf32> to vector<6x32xf32>
    %cst = arith.constant 0.000000e+00 : f32
    %9 = vector.broadcast %cst : f32 to vector<8x32xf32>
    %c0_8 = arith.constant 0 : index
    %c0_9 = arith.constant 0 : index
    %c0_10 = arith.constant 0 : index
    %c0_11 = arith.constant 0 : index
    %10 = vector.load %arg4[%c0_8, %c0_9, %c0_10, %c0_11] : memref<1x4x32x8xbf16, #tpu.memory_space<vmem>>, vector<1x1x32x8xbf16>
    %11 = vector.shape_cast %10 : vector<1x1x32x8xbf16> to vector<32x8xbf16>
    %cst_12 = arith.constant dense<0.000000e+00> : vector<8x8xf32>
    %12 = tpu.matmul %4, %11, %cst_12 {dimension_numbers = #tpu.dot_dimension_numbers<[1], [0], [0], [1], [0, 0, 1, 1], [], []>} : vector<8x32xbf16>, vector<32x8xbf16>, vector<8x8xf32> -> vector<8x8xf32>
    %c0_13 = arith.constant 0 : index
    %c0_14 = arith.constant 0 : index
    %c0_15 = arith.constant 0 : index
    %c0_16 = arith.constant 0 : index
    %13 = vector.load %arg7[%c0_13, %c0_14, %c0_15, %c0_16] : memref<1x4x1x8xf32, #tpu.memory_space<vmem>>, vector<1x1x1x8xf32>
    %14 = vector.shape_cast %13 : vector<1x1x1x8xf32> to vector<1x8xf32>
    %15 = vector.broadcast %14 : vector<1x8xf32> to vector<8x8xf32>
    %16 = arith.addf %12, %15 : vector<8x8xf32>
    %c0_17 = arith.constant 0 : index
    %c0_18 = arith.constant 0 : index
    %c0_19 = arith.constant 0 : index
    %c0_20 = arith.constant 0 : index
    %17 = vector.load %arg5[%c0_17, %c0_18, %c0_19, %c0_20] : memref<1x4x32x8xbf16, #tpu.memory_space<vmem>>, vector<1x1x32x8xbf16>
    %18 = vector.shape_cast %17 : vector<1x1x32x8xbf16> to vector<32x8xbf16>
    %cst_21 = arith.constant dense<0.000000e+00> : vector<8x8xf32>
    %19 = tpu.matmul %4, %18, %cst_21 {dimension_numbers = #tpu.dot_dimension_numbers<[1], [0], [0], [1], [0, 0, 1, 1], [], []>} : vector<8x32xbf16>, vector<32x8xbf16>, vector<8x8xf32> -> vector<8x8xf32>
    %c0_22 = arith.constant 0 : index
    %c0_23 = arith.constant 0 : index
    %c0_24 = arith.constant 0 : index
    %c0_25 = arith.constant 0 : index
    %20 = vector.load %arg8[%c0_22, %c0_23, %c0_24, %c0_25] : memref<1x4x1x8xf32, #tpu.memory_space<vmem>>, vector<1x1x1x8xf32>
    %21 = vector.shape_cast %20 : vector<1x1x1x8xf32> to vector<1x8xf32>
    %22 = vector.broadcast %21 : vector<1x8xf32> to vector<8x8xf32>
    %23 = arith.addf %19, %22 : vector<8x8xf32>
    %c0_26 = arith.constant 0 : index
    %c0_27 = arith.constant 0 : index
    %c0_28 = arith.constant 0 : index
    %c0_29 = arith.constant 0 : index
    %24 = vector.load %arg6[%c0_26, %c0_27, %c0_28, %c0_29] : memref<1x4x32x8xbf16, #tpu.memory_space<vmem>>, vector<1x1x32x8xbf16>
    %25 = vector.shape_cast %24 : vector<1x1x32x8xbf16> to vector<32x8xbf16>
    %cst_30 = arith.constant dense<0.000000e+00> : vector<8x8xf32>
    %26 = tpu.matmul %4, %25, %cst_30 {dimension_numbers = #tpu.dot_dimension_numbers<[1], [0], [0], [1], [0, 0, 1, 1], [], []>} : vector<8x32xbf16>, vector<32x8xbf16>, vector<8x8xf32> -> vector<8x8xf32>
    %c0_31 = arith.constant 0 : index
    %c0_32 = arith.constant 0 : index
    %c0_33 = arith.constant 0 : index
    %c0_34 = arith.constant 0 : index
    %27 = vector.load %arg9[%c0_31, %c0_32, %c0_33, %c0_34] : memref<1x4x1x8xf32, #tpu.memory_space<vmem>>, vector<1x1x1x8xf32>
    %28 = vector.shape_cast %27 : vector<1x1x1x8xf32> to vector<1x8xf32>
    %29 = vector.broadcast %28 : vector<1x8xf32> to vector<8x8xf32>
    %30 = arith.addf %26, %29 : vector<8x8xf32>
    %31 = arith.truncf %16 : vector<8x8xf32> to vector<8x8xbf16>
    %32 = arith.truncf %23 : vector<8x8xf32> to vector<8x8xbf16>
    %cst_35 = arith.constant dense<0.000000e+00> : vector<8x8xf32>
    %33 = tpu.matmul %31, %32, %cst_35 {dimension_numbers = #tpu.dot_dimension_numbers<[1], [1], [0], [0], [0, 0, 1, 0], [], []>} : vector<8x8xbf16>, vector<8x8xbf16>, vector<8x8xf32> -> vector<8x8xf32>
    %34 = vector.broadcast %6 : vector<1x8xf32> to vector<8x8xf32>
    %35 = arith.addf %33, %34 : vector<8x8xf32>
    %cst_36 = arith.constant dense<0xFF800000> : vector<8xf32>
    %36 = vector.multi_reduction <maximumf>, %35, %cst_36 [1] : vector<8x8xf32> to vector<8xf32>
    %37 = vector.shape_cast %36 : vector<8xf32> to vector<8x1xf32>
    %38 = vector.broadcast %37 : vector<8x1xf32> to vector<8x8xf32>
    %39 = arith.subf %35, %38 : vector<8x8xf32>
    %40 = math.exp %39 : vector<8x8xf32>
    %cst_37 = arith.constant dense<0.000000e+00> : vector<8xf32>
    %41 = vector.multi_reduction <add>, %40, %cst_37 [1] : vector<8x8xf32> to vector<8xf32>
    %42 = vector.shape_cast %41 : vector<8xf32> to vector<8x1xf32>
    %43 = arith.truncf %40 : vector<8x8xf32> to vector<8x8xbf16>
    %44 = arith.truncf %30 : vector<8x8xf32> to vector<8x8xbf16>
    %cst_38 = arith.constant dense<0.000000e+00> : vector<8x8xf32>
    %45 = tpu.matmul %43, %44, %cst_38 {dimension_numbers = #tpu.dot_dimension_numbers<[1], [0], [0], [1], [0, 0, 1, 1], [], []>} : vector<8x8xbf16>, vector<8x8xbf16>, vector<8x8xf32> -> vector<8x8xf32>
    %46 = tpu.reciprocal %42 {approx = true} : vector<8x1xf32> -> vector<8x1xf32>
    %47 = vector.broadcast %46 : vector<8x1xf32> to vector<8x8xf32>
    %48 = arith.mulf %45, %47 : vector<8x8xf32>
    %49 = arith.truncf %48 : vector<8x8xf32> to vector<8x8xbf16>
    %c0_39 = arith.constant 0 : index
    %c0_40 = arith.constant 0 : index
    %c0_41 = arith.constant 0 : index
    %c0_42 = arith.constant 0 : index
    %50 = vector.load %arg10[%c0_39, %c0_40, %c0_41, %c0_42] : memref<1x4x8x32xbf16, #tpu.memory_space<vmem>>, vector<1x1x8x32xbf16>
    %51 = vector.shape_cast %50 : vector<1x1x8x32xbf16> to vector<8x32xbf16>
    %cst_43 = arith.constant dense<0.000000e+00> : vector<8x32xf32>
    %52 = tpu.matmul %49, %51, %cst_43 {dimension_numbers = #tpu.dot_dimension_numbers<[1], [0], [0], [1], [0, 0, 1, 1], [], []>} : vector<8x8xbf16>, vector<8x32xbf16>, vector<8x32xf32> -> vector<8x32xf32>
    %53 = arith.addf %9, %52 : vector<8x32xf32>
    %c0_44 = arith.constant 0 : index
    %c1 = arith.constant 1 : index
    %c0_45 = arith.constant 0 : index
    %c0_46 = arith.constant 0 : index
    %54 = vector.load %arg4[%c0_44, %c1, %c0_45, %c0_46] : memref<1x4x32x8xbf16, #tpu.memory_space<vmem>>, vector<1x1x32x8xbf16>
    %55 = vector.shape_cast %54 : vector<1x1x32x8xbf16> to vector<32x8xbf16>
    %cst_47 = arith.constant dense<0.000000e+00> : vector<8x8xf32>
    %56 = tpu.matmul %4, %55, %cst_47 {dimension_numbers = #tpu.dot_dimension_numbers<[1], [0], [0], [1], [0, 0, 1, 1], [], []>} : vector<8x32xbf16>, vector<32x8xbf16>, vector<8x8xf32> -> vector<8x8xf32>
    %c0_48 = arith.constant 0 : index
    %c1_49 = arith.constant 1 : index
    %c0_50 = arith.constant 0 : index
    %c0_51 = arith.constant 0 : index
    %57 = vector.load %arg7[%c0_48, %c1_49, %c0_50, %c0_51] : memref<1x4x1x8xf32, #tpu.memory_space<vmem>>, vector<1x1x1x8xf32>
    %58 = vector.shape_cast %57 : vector<1x1x1x8xf32> to vector<1x8xf32>
    %59 = vector.broadcast %58 : vector<1x8xf32> to vector<8x8xf32>
    %60 = arith.addf %56, %59 : vector<8x8xf32>
    %c0_52 = arith.constant 0 : index
    %c1_53 = arith.constant 1 : index
    %c0_54 = arith.constant 0 : index
    %c0_55 = arith.constant 0 : index
    %61 = vector.load %arg5[%c0_52, %c1_53, %c0_54, %c0_55] : memref<1x4x32x8xbf16, #tpu.memory_space<vmem>>, vector<1x1x32x8xbf16>
    %62 = vector.shape_cast %61 : vector<1x1x32x8xbf16> to vector<32x8xbf16>
    %cst_56 = arith.constant dense<0.000000e+00> : vector<8x8xf32>
    %63 = tpu.matmul %4, %62, %cst_56 {dimension_numbers = #tpu.dot_dimension_numbers<[1], [0], [0], [1], [0, 0, 1, 1], [], []>} : vector<8x32xbf16>, vector<32x8xbf16>, vector<8x8xf32> -> vector<8x8xf32>
    %c0_57 = arith.constant 0 : index
    %c1_58 = arith.constant 1 : index
    %c0_59 = arith.constant 0 : index
    %c0_60 = arith.constant 0 : index
    %64 = vector.load %arg8[%c0_57, %c1_58, %c0_59, %c0_60] : memref<1x4x1x8xf32, #tpu.memory_space<vmem>>, vector<1x1x1x8xf32>
    %65 = vector.shape_cast %64 : vector<1x1x1x8xf32> to vector<1x8xf32>
    %66 = vector.broadcast %65 : vector<1x8xf32> to vector<8x8xf32>
    %67 = arith.addf %63, %66 : vector<8x8xf32>
    %c0_61 = arith.constant 0 : index
    %c1_62 = arith.constant 1 : index
    %c0_63 = arith.constant 0 : index
    %c0_64 = arith.constant 0 : index
    %68 = vector.load %arg6[%c0_61, %c1_62, %c0_63, %c0_64] : memref<1x4x32x8xbf16, #tpu.memory_space<vmem>>, vector<1x1x32x8xbf16>
    %69 = vector.shape_cast %68 : vector<1x1x32x8xbf16> to vector<32x8xbf16>
    %cst_65 = arith.constant dense<0.000000e+00> : vector<8x8xf32>
    %70 = tpu.matmul %4, %69, %cst_65 {dimension_numbers = #tpu.dot_dimension_numbers<[1], [0], [0], [1], [0, 0, 1, 1], [], []>} : vector<8x32xbf16>, vector<32x8xbf16>, vector<8x8xf32> -> vector<8x8xf32>
    %c0_66 = arith.constant 0 : index
    %c1_67 = arith.constant 1 : index
    %c0_68 = arith.constant 0 : index
    %c0_69 = arith.constant 0 : index
    %71 = vector.load %arg9[%c0_66, %c1_67, %c0_68, %c0_69] : memref<1x4x1x8xf32, #tpu.memory_space<vmem>>, vector<1x1x1x8xf32>
    %72 = vector.shape_cast %71 : vector<1x1x1x8xf32> to vector<1x8xf32>
    %73 = vector.broadcast %72 : vector<1x8xf32> to vector<8x8xf32>
    %74 = arith.addf %70, %73 : vector<8x8xf32>
    %75 = arith.truncf %60 : vector<8x8xf32> to vector<8x8xbf16>
    %76 = arith.truncf %67 : vector<8x8xf32> to vector<8x8xbf16>
    %cst_70 = arith.constant dense<0.000000e+00> : vector<8x8xf32>
    %77 = tpu.matmul %75, %76, %cst_70 {dimension_numbers = #tpu.dot_dimension_numbers<[1], [1], [0], [0], [0, 0, 1, 0], [], []>} : vector<8x8xbf16>, vector<8x8xbf16>, vector<8x8xf32> -> vector<8x8xf32>
    %78 = vector.broadcast %6 : vector<1x8xf32> to vector<8x8xf32>
    %79 = arith.addf %77, %78 : vector<8x8xf32>
    %cst_71 = arith.constant dense<0xFF800000> : vector<8xf32>
    %80 = vector.multi_reduction <maximumf>, %79, %cst_71 [1] : vector<8x8xf32> to vector<8xf32>
    %81 = vector.shape_cast %80 : vector<8xf32> to vector<8x1xf32>
    %82 = vector.broadcast %81 : vector<8x1xf32> to vector<8x8xf32>
    %83 = arith.subf %79, %82 : vector<8x8xf32>
    %84 = math.exp %83 : vector<8x8xf32>
    %cst_72 = arith.constant dense<0.000000e+00> : vector<8xf32>
    %85 = vector.multi_reduction <add>, %84, %cst_72 [1] : vector<8x8xf32> to vector<8xf32>
    %86 = vector.shape_cast %85 : vector<8xf32> to vector<8x1xf32>
    %87 = arith.truncf %84 : vector<8x8xf32> to vector<8x8xbf16>
    %88 = arith.truncf %74 : vector<8x8xf32> to vector<8x8xbf16>
    %cst_73 = arith.constant dense<0.000000e+00> : vector<8x8xf32>
    %89 = tpu.matmul %87, %88, %cst_73 {dimension_numbers = #tpu.dot_dimension_numbers<[1], [0], [0], [1], [0, 0, 1, 1], [], []>} : vector<8x8xbf16>, vector<8x8xbf16>, vector<8x8xf32> -> vector<8x8xf32>
    %90 = tpu.reciprocal %86 {approx = true} : vector<8x1xf32> -> vector<8x1xf32>
    %91 = vector.broadcast %90 : vector<8x1xf32> to vector<8x8xf32>
    %92 = arith.mulf %89, %91 : vector<8x8xf32>
    %93 = arith.truncf %92 : vector<8x8xf32> to vector<8x8xbf16>
    %c0_74 = arith.constant 0 : index
    %c1_75 = arith.constant 1 : index
    %c0_76 = arith.constant 0 : index
    %c0_77 = arith.constant 0 : index
    %94 = vector.load %arg10[%c0_74, %c1_75, %c0_76, %c0_77] : memref<1x4x8x32xbf16, #tpu.memory_space<vmem>>, vector<1x1x8x32xbf16>
    %95 = vector.shape_cast %94 : vector<1x1x8x32xbf16> to vector<8x32xbf16>
    %cst_78 = arith.constant dense<0.000000e+00> : vector<8x32xf32>
    %96 = tpu.matmul %93, %95, %cst_78 {dimension_numbers = #tpu.dot_dimension_numbers<[1], [0], [0], [1], [0, 0, 1, 1], [], []>} : vector<8x8xbf16>, vector<8x32xbf16>, vector<8x32xf32> -> vector<8x32xf32>
    %97 = arith.addf %53, %96 : vector<8x32xf32>
    %c0_79 = arith.constant 0 : index
    %c2 = arith.constant 2 : index
    %c0_80 = arith.constant 0 : index
    %c0_81 = arith.constant 0 : index
    %98 = vector.load %arg4[%c0_79, %c2, %c0_80, %c0_81] : memref<1x4x32x8xbf16, #tpu.memory_space<vmem>>, vector<1x1x32x8xbf16>
    %99 = vector.shape_cast %98 : vector<1x1x32x8xbf16> to vector<32x8xbf16>
    %cst_82 = arith.constant dense<0.000000e+00> : vector<8x8xf32>
    %100 = tpu.matmul %4, %99, %cst_82 {dimension_numbers = #tpu.dot_dimension_numbers<[1], [0], [0], [1], [0, 0, 1, 1], [], []>} : vector<8x32xbf16>, vector<32x8xbf16>, vector<8x8xf32> -> vector<8x8xf32>
    %c0_83 = arith.constant 0 : index
    %c2_84 = arith.constant 2 : index
    %c0_85 = arith.constant 0 : index
    %c0_86 = arith.constant 0 : index
    %101 = vector.load %arg7[%c0_83, %c2_84, %c0_85, %c0_86] : memref<1x4x1x8xf32, #tpu.memory_space<vmem>>, vector<1x1x1x8xf32>
    %102 = vector.shape_cast %101 : vector<1x1x1x8xf32> to vector<1x8xf32>
    %103 = vector.broadcast %102 : vector<1x8xf32> to vector<8x8xf32>
    %104 = arith.addf %100, %103 : vector<8x8xf32>
    %c0_87 = arith.constant 0 : index
    %c2_88 = arith.constant 2 : index
    %c0_89 = arith.constant 0 : index
    %c0_90 = arith.constant 0 : index
    %105 = vector.load %arg5[%c0_87, %c2_88, %c0_89, %c0_90] : memref<1x4x32x8xbf16, #tpu.memory_space<vmem>>, vector<1x1x32x8xbf16>
    %106 = vector.shape_cast %105 : vector<1x1x32x8xbf16> to vector<32x8xbf16>
    %cst_91 = arith.constant dense<0.000000e+00> : vector<8x8xf32>
    %107 = tpu.matmul %4, %106, %cst_91 {dimension_numbers = #tpu.dot_dimension_numbers<[1], [0], [0], [1], [0, 0, 1, 1], [], []>} : vector<8x32xbf16>, vector<32x8xbf16>, vector<8x8xf32> -> vector<8x8xf32>
    %c0_92 = arith.constant 0 : index
    %c2_93 = arith.constant 2 : index
    %c0_94 = arith.constant 0 : index
    %c0_95 = arith.constant 0 : index
    %108 = vector.load %arg8[%c0_92, %c2_93, %c0_94, %c0_95] : memref<1x4x1x8xf32, #tpu.memory_space<vmem>>, vector<1x1x1x8xf32>
    %109 = vector.shape_cast %108 : vector<1x1x1x8xf32> to vector<1x8xf32>
    %110 = vector.broadcast %109 : vector<1x8xf32> to vector<8x8xf32>
    %111 = arith.addf %107, %110 : vector<8x8xf32>
    %c0_96 = arith.constant 0 : index
    %c2_97 = arith.constant 2 : index
    %c0_98 = arith.constant 0 : index
    %c0_99 = arith.constant 0 : index
    %112 = vector.load %arg6[%c0_96, %c2_97, %c0_98, %c0_99] : memref<1x4x32x8xbf16, #tpu.memory_space<vmem>>, vector<1x1x32x8xbf16>
    %113 = vector.shape_cast %112 : vector<1x1x32x8xbf16> to vector<32x8xbf16>
    %cst_100 = arith.constant dense<0.000000e+00> : vector<8x8xf32>
    %114 = tpu.matmul %4, %113, %cst_100 {dimension_numbers = #tpu.dot_dimension_numbers<[1], [0], [0], [1], [0, 0, 1, 1], [], []>} : vector<8x32xbf16>, vector<32x8xbf16>, vector<8x8xf32> -> vector<8x8xf32>
    %c0_101 = arith.constant 0 : index
    %c2_102 = arith.constant 2 : index
    %c0_103 = arith.constant 0 : index
    %c0_104 = arith.constant 0 : index
    %115 = vector.load %arg9[%c0_101, %c2_102, %c0_103, %c0_104] : memref<1x4x1x8xf32, #tpu.memory_space<vmem>>, vector<1x1x1x8xf32>
    %116 = vector.shape_cast %115 : vector<1x1x1x8xf32> to vector<1x8xf32>
    %117 = vector.broadcast %116 : vector<1x8xf32> to vector<8x8xf32>
    %118 = arith.addf %114, %117 : vector<8x8xf32>
    %119 = arith.truncf %104 : vector<8x8xf32> to vector<8x8xbf16>
    %120 = arith.truncf %111 : vector<8x8xf32> to vector<8x8xbf16>
    %cst_105 = arith.constant dense<0.000000e+00> : vector<8x8xf32>
    %121 = tpu.matmul %119, %120, %cst_105 {dimension_numbers = #tpu.dot_dimension_numbers<[1], [1], [0], [0], [0, 0, 1, 0], [], []>} : vector<8x8xbf16>, vector<8x8xbf16>, vector<8x8xf32> -> vector<8x8xf32>
    %122 = vector.broadcast %6 : vector<1x8xf32> to vector<8x8xf32>
    %123 = arith.addf %121, %122 : vector<8x8xf32>
    %cst_106 = arith.constant dense<0xFF800000> : vector<8xf32>
    %124 = vector.multi_reduction <maximumf>, %123, %cst_106 [1] : vector<8x8xf32> to vector<8xf32>
    %125 = vector.shape_cast %124 : vector<8xf32> to vector<8x1xf32>
    %126 = vector.broadcast %125 : vector<8x1xf32> to vector<8x8xf32>
    %127 = arith.subf %123, %126 : vector<8x8xf32>
    %128 = math.exp %127 : vector<8x8xf32>
    %cst_107 = arith.constant dense<0.000000e+00> : vector<8xf32>
    %129 = vector.multi_reduction <add>, %128, %cst_107 [1] : vector<8x8xf32> to vector<8xf32>
    %130 = vector.shape_cast %129 : vector<8xf32> to vector<8x1xf32>
    %131 = arith.truncf %128 : vector<8x8xf32> to vector<8x8xbf16>
    %132 = arith.truncf %118 : vector<8x8xf32> to vector<8x8xbf16>
    %cst_108 = arith.constant dense<0.000000e+00> : vector<8x8xf32>
    %133 = tpu.matmul %131, %132, %cst_108 {dimension_numbers = #tpu.dot_dimension_numbers<[1], [0], [0], [1], [0, 0, 1, 1], [], []>} : vector<8x8xbf16>, vector<8x8xbf16>, vector<8x8xf32> -> vector<8x8xf32>
    %134 = tpu.reciprocal %130 {approx = true} : vector<8x1xf32> -> vector<8x1xf32>
    %135 = vector.broadcast %134 : vector<8x1xf32> to vector<8x8xf32>
    %136 = arith.mulf %133, %135 : vector<8x8xf32>
    %137 = arith.truncf %136 : vector<8x8xf32> to vector<8x8xbf16>
    %c0_109 = arith.constant 0 : index
    %c2_110 = arith.constant 2 : index
    %c0_111 = arith.constant 0 : index
    %c0_112 = arith.constant 0 : index
    %138 = vector.load %arg10[%c0_109, %c2_110, %c0_111, %c0_112] : memref<1x4x8x32xbf16, #tpu.memory_space<vmem>>, vector<1x1x8x32xbf16>
    %139 = vector.shape_cast %138 : vector<1x1x8x32xbf16> to vector<8x32xbf16>
    %cst_113 = arith.constant dense<0.000000e+00> : vector<8x32xf32>
    %140 = tpu.matmul %137, %139, %cst_113 {dimension_numbers = #tpu.dot_dimension_numbers<[1], [0], [0], [1], [0, 0, 1, 1], [], []>} : vector<8x8xbf16>, vector<8x32xbf16>, vector<8x32xf32> -> vector<8x32xf32>
    %141 = arith.addf %97, %140 : vector<8x32xf32>
    %c0_114 = arith.constant 0 : index
    %c3 = arith.constant 3 : index
    %c0_115 = arith.constant 0 : index
    %c0_116 = arith.constant 0 : index
    %142 = vector.load %arg4[%c0_114, %c3, %c0_115, %c0_116] : memref<1x4x32x8xbf16, #tpu.memory_space<vmem>>, vector<1x1x32x8xbf16>
    %143 = vector.shape_cast %142 : vector<1x1x32x8xbf16> to vector<32x8xbf16>
    %cst_117 = arith.constant dense<0.000000e+00> : vector<8x8xf32>
    %144 = tpu.matmul %4, %143, %cst_117 {dimension_numbers = #tpu.dot_dimension_numbers<[1], [0], [0], [1], [0, 0, 1, 1], [], []>} : vector<8x32xbf16>, vector<32x8xbf16>, vector<8x8xf32> -> vector<8x8xf32>
    %c0_118 = arith.constant 0 : index
    %c3_119 = arith.constant 3 : index
    %c0_120 = arith.constant 0 : index
    %c0_121 = arith.constant 0 : index
    %145 = vector.load %arg7[%c0_118, %c3_119, %c0_120, %c0_121] : memref<1x4x1x8xf32, #tpu.memory_space<vmem>>, vector<1x1x1x8xf32>
    %146 = vector.shape_cast %145 : vector<1x1x1x8xf32> to vector<1x8xf32>
    %147 = vector.broadcast %146 : vector<1x8xf32> to vector<8x8xf32>
    %148 = arith.addf %144, %147 : vector<8x8xf32>
    %c0_122 = arith.constant 0 : index
    %c3_123 = arith.constant 3 : index
    %c0_124 = arith.constant 0 : index
    %c0_125 = arith.constant 0 : index
    %149 = vector.load %arg5[%c0_122, %c3_123, %c0_124, %c0_125] : memref<1x4x32x8xbf16, #tpu.memory_space<vmem>>, vector<1x1x32x8xbf16>
    %150 = vector.shape_cast %149 : vector<1x1x32x8xbf16> to vector<32x8xbf16>
    %cst_126 = arith.constant dense<0.000000e+00> : vector<8x8xf32>
    %151 = tpu.matmul %4, %150, %cst_126 {dimension_numbers = #tpu.dot_dimension_numbers<[1], [0], [0], [1], [0, 0, 1, 1], [], []>} : vector<8x32xbf16>, vector<32x8xbf16>, vector<8x8xf32> -> vector<8x8xf32>
    %c0_127 = arith.constant 0 : index
    %c3_128 = arith.constant 3 : index
    %c0_129 = arith.constant 0 : index
    %c0_130 = arith.constant 0 : index
    %152 = vector.load %arg8[%c0_127, %c3_128, %c0_129, %c0_130] : memref<1x4x1x8xf32, #tpu.memory_space<vmem>>, vector<1x1x1x8xf32>
    %153 = vector.shape_cast %152 : vector<1x1x1x8xf32> to vector<1x8xf32>
    %154 = vector.broadcast %153 : vector<1x8xf32> to vector<8x8xf32>
    %155 = arith.addf %151, %154 : vector<8x8xf32>
    %c0_131 = arith.constant 0 : index
    %c3_132 = arith.constant 3 : index
    %c0_133 = arith.constant 0 : index
    %c0_134 = arith.constant 0 : index
    %156 = vector.load %arg6[%c0_131, %c3_132, %c0_133, %c0_134] : memref<1x4x32x8xbf16, #tpu.memory_space<vmem>>, vector<1x1x32x8xbf16>
    %157 = vector.shape_cast %156 : vector<1x1x32x8xbf16> to vector<32x8xbf16>
    %cst_135 = arith.constant dense<0.000000e+00> : vector<8x8xf32>
    %158 = tpu.matmul %4, %157, %cst_135 {dimension_numbers = #tpu.dot_dimension_numbers<[1], [0], [0], [1], [0, 0, 1, 1], [], []>} : vector<8x32xbf16>, vector<32x8xbf16>, vector<8x8xf32> -> vector<8x8xf32>
    %c0_136 = arith.constant 0 : index
    %c3_137 = arith.constant 3 : index
    %c0_138 = arith.constant 0 : index
    %c0_139 = arith.constant 0 : index
    %159 = vector.load %arg9[%c0_136, %c3_137, %c0_138, %c0_139] : memref<1x4x1x8xf32, #tpu.memory_space<vmem>>, vector<1x1x1x8xf32>
    %160 = vector.shape_cast %159 : vector<1x1x1x8xf32> to vector<1x8xf32>
    %161 = vector.broadcast %160 : vector<1x8xf32> to vector<8x8xf32>
    %162 = arith.addf %158, %161 : vector<8x8xf32>
    %163 = arith.truncf %148 : vector<8x8xf32> to vector<8x8xbf16>
    %164 = arith.truncf %155 : vector<8x8xf32> to vector<8x8xbf16>
    %cst_140 = arith.constant dense<0.000000e+00> : vector<8x8xf32>
    %165 = tpu.matmul %163, %164, %cst_140 {dimension_numbers = #tpu.dot_dimension_numbers<[1], [1], [0], [0], [0, 0, 1, 0], [], []>} : vector<8x8xbf16>, vector<8x8xbf16>, vector<8x8xf32> -> vector<8x8xf32>
    %166 = vector.broadcast %6 : vector<1x8xf32> to vector<8x8xf32>
    %167 = arith.addf %165, %166 : vector<8x8xf32>
    %cst_141 = arith.constant dense<0xFF800000> : vector<8xf32>
    %168 = vector.multi_reduction <maximumf>, %167, %cst_141 [1] : vector<8x8xf32> to vector<8xf32>
    %169 = vector.shape_cast %168 : vector<8xf32> to vector<8x1xf32>
    %170 = vector.broadcast %169 : vector<8x1xf32> to vector<8x8xf32>
    %171 = arith.subf %167, %170 : vector<8x8xf32>
    %172 = math.exp %171 : vector<8x8xf32>
    %cst_142 = arith.constant dense<0.000000e+00> : vector<8xf32>
    %173 = vector.multi_reduction <add>, %172, %cst_142 [1] : vector<8x8xf32> to vector<8xf32>
    %174 = vector.shape_cast %173 : vector<8xf32> to vector<8x1xf32>
    %175 = arith.truncf %172 : vector<8x8xf32> to vector<8x8xbf16>
    %176 = arith.truncf %162 : vector<8x8xf32> to vector<8x8xbf16>
    %cst_143 = arith.constant dense<0.000000e+00> : vector<8x8xf32>
    %177 = tpu.matmul %175, %176, %cst_143 {dimension_numbers = #tpu.dot_dimension_numbers<[1], [0], [0], [1], [0, 0, 1, 1], [], []>} : vector<8x8xbf16>, vector<8x8xbf16>, vector<8x8xf32> -> vector<8x8xf32>
    %178 = tpu.reciprocal %174 {approx = true} : vector<8x1xf32> -> vector<8x1xf32>
    %179 = vector.broadcast %178 : vector<8x1xf32> to vector<8x8xf32>
    %180 = arith.mulf %177, %179 : vector<8x8xf32>
    %181 = arith.truncf %180 : vector<8x8xf32> to vector<8x8xbf16>
    %c0_144 = arith.constant 0 : index
    %c3_145 = arith.constant 3 : index
    %c0_146 = arith.constant 0 : index
    %c0_147 = arith.constant 0 : index
    %182 = vector.load %arg10[%c0_144, %c3_145, %c0_146, %c0_147] : memref<1x4x8x32xbf16, #tpu.memory_space<vmem>>, vector<1x1x8x32xbf16>
    %183 = vector.shape_cast %182 : vector<1x1x8x32xbf16> to vector<8x32xbf16>
    %cst_148 = arith.constant dense<0.000000e+00> : vector<8x32xf32>
    %184 = tpu.matmul %181, %183, %cst_148 {dimension_numbers = #tpu.dot_dimension_numbers<[1], [0], [0], [1], [0, 0, 1, 1], [], []>} : vector<8x8xbf16>, vector<8x32xbf16>, vector<8x32xf32> -> vector<8x32xf32>
    %185 = arith.addf %141, %184 : vector<8x32xf32>
    %186 = vector.extract_strided_slice %8 {offsets = [0, 0], sizes = [1, 32], strides = [1, 1]} : vector<6x32xf32> to vector<1x32xf32>
    %187 = vector.broadcast %186 : vector<1x32xf32> to vector<8x32xf32>
    %188 = arith.addf %185, %187 : vector<8x32xf32>
    %189 = arith.addf %188, %3 : vector<8x32xf32>
    %190 = vector.extract_strided_slice %8 {offsets = [1, 0], sizes = [1, 32], strides = [1, 1]} : vector<6x32xf32> to vector<1x32xf32>
    %191 = vector.extract_strided_slice %8 {offsets = [2, 0], sizes = [1, 32], strides = [1, 1]} : vector<6x32xf32> to vector<1x32xf32>
    %cst_149 = arith.constant dense<0.000000e+00> : vector<8xf32>
    %192 = vector.multi_reduction <add>, %189, %cst_149 [1] : vector<8x32xf32> to vector<8xf32>
    %193 = vector.shape_cast %192 : vector<8xf32> to vector<8x1xf32>
    %cst_150 = arith.constant 3.200000e+01 : f32
    %194 = vector.broadcast %cst_150 : f32 to vector<8x1xf32>
    %195 = arith.divf %193, %194 : vector<8x1xf32>
    %196 = vector.broadcast %195 : vector<8x1xf32> to vector<8x32xf32>
    %197 = arith.subf %189, %196 : vector<8x32xf32>
    %198 = vector.broadcast %195 : vector<8x1xf32> to vector<8x32xf32>
    %199 = arith.subf %189, %198 : vector<8x32xf32>
    %200 = arith.mulf %197, %199 : vector<8x32xf32>
    %cst_151 = arith.constant dense<0.000000e+00> : vector<8xf32>
    %201 = vector.multi_reduction <add>, %200, %cst_151 [1] : vector<8x32xf32> to vector<8xf32>
    %202 = vector.shape_cast %201 : vector<8xf32> to vector<8x1xf32>
    %cst_152 = arith.constant 3.200000e+01 : f32
    %203 = vector.broadcast %cst_152 : f32 to vector<8x1xf32>
    %204 = arith.divf %202, %203 : vector<8x1xf32>
    %205 = vector.broadcast %195 : vector<8x1xf32> to vector<8x32xf32>
    %206 = arith.subf %189, %205 : vector<8x32xf32>
    %cst_153 = arith.constant 9.99999996E-13 : f32
    %207 = vector.broadcast %cst_153 : f32 to vector<8x1xf32>
    %208 = arith.addf %204, %207 : vector<8x1xf32>
    %209 = math.rsqrt %208 : vector<8x1xf32>
    %210 = vector.broadcast %209 : vector<8x1xf32> to vector<8x32xf32>
    %211 = arith.mulf %206, %210 : vector<8x32xf32>
    %212 = vector.broadcast %190 : vector<1x32xf32> to vector<8x32xf32>
    %213 = arith.mulf %211, %212 : vector<8x32xf32>
    %214 = vector.broadcast %191 : vector<1x32xf32> to vector<8x32xf32>
    %215 = arith.addf %213, %214 : vector<8x32xf32>
    %216 = arith.truncf %215 : vector<8x32xf32> to vector<8x32xbf16>
    %c0_154 = arith.constant 0 : index
    %c0_155 = arith.constant 0 : index
    %c0_156 = arith.constant 0 : index
    %217 = vector.load %arg11[%c0_154, %c0_155, %c0_156] : memref<1x32x64xbf16, #tpu.memory_space<vmem>>, vector<1x32x64xbf16>
    %218 = vector.shape_cast %217 : vector<1x32x64xbf16> to vector<32x64xbf16>
    %cst_157 = arith.constant dense<0.000000e+00> : vector<8x64xf32>
    %219 = tpu.matmul %216, %218, %cst_157 {dimension_numbers = #tpu.dot_dimension_numbers<[1], [0], [0], [1], [0, 0, 1, 1], [], []>} : vector<8x32xbf16>, vector<32x64xbf16>, vector<8x64xf32> -> vector<8x64xf32>
    %c0_158 = arith.constant 0 : index
    %c0_159 = arith.constant 0 : index
    %c0_160 = arith.constant 0 : index
    %220 = vector.load %arg13[%c0_158, %c0_159, %c0_160] : memref<1x1x64xf32, #tpu.memory_space<vmem>>, vector<1x1x64xf32>
    %221 = vector.shape_cast %220 : vector<1x1x64xf32> to vector<1x64xf32>
    %222 = vector.broadcast %221 : vector<1x64xf32> to vector<8x64xf32>
    %223 = arith.addf %219, %222 : vector<8x64xf32>
    %cst_161 = arith.constant 5.000000e-01 : f32
    %224 = vector.broadcast %cst_161 : f32 to vector<8x64xf32>
    %225 = arith.mulf %223, %224 : vector<8x64xf32>
    %cst_162 = arith.constant 0.707106769 : f32
    %226 = vector.broadcast %cst_162 : f32 to vector<8x64xf32>
    %227 = arith.mulf %223, %226 : vector<8x64xf32>
    %228 = math.erf %227 : vector<8x64xf32>
    %cst_163 = arith.constant 1.000000e+00 : f32
    %229 = vector.broadcast %cst_163 : f32 to vector<8x64xf32>
    %230 = arith.addf %229, %228 : vector<8x64xf32>
    %231 = arith.mulf %225, %230 : vector<8x64xf32>
    %232 = arith.truncf %231 : vector<8x64xf32> to vector<8x64xbf16>
    %c0_164 = arith.constant 0 : index
    %c0_165 = arith.constant 0 : index
    %c0_166 = arith.constant 0 : index
    %233 = vector.load %arg12[%c0_164, %c0_165, %c0_166] : memref<1x64x32xbf16, #tpu.memory_space<vmem>>, vector<1x64x32xbf16>
    %234 = vector.shape_cast %233 : vector<1x64x32xbf16> to vector<64x32xbf16>
    %cst_167 = arith.constant dense<0.000000e+00> : vector<8x32xf32>
    %235 = tpu.matmul %232, %234, %cst_167 {dimension_numbers = #tpu.dot_dimension_numbers<[1], [0], [0], [1], [0, 0, 1, 1], [], []>} : vector<8x64xbf16>, vector<64x32xbf16>, vector<8x32xf32> -> vector<8x32xf32>
    %236 = vector.extract_strided_slice %8 {offsets = [3, 0], sizes = [1, 32], strides = [1, 1]} : vector<6x32xf32> to vector<1x32xf32>
    %237 = vector.broadcast %236 : vector<1x32xf32> to vector<8x32xf32>
    %238 = arith.addf %235, %237 : vector<8x32xf32>
    %239 = arith.addf %238, %215 : vector<8x32xf32>
    %240 = vector.extract_strided_slice %8 {offsets = [4, 0], sizes = [1, 32], strides = [1, 1]} : vector<6x32xf32> to vector<1x32xf32>
    %241 = vector.extract_strided_slice %8 {offsets = [5, 0], sizes = [1, 32], strides = [1, 1]} : vector<6x32xf32> to vector<1x32xf32>
    %cst_168 = arith.constant dense<0.000000e+00> : vector<8xf32>
    %242 = vector.multi_reduction <add>, %239, %cst_168 [1] : vector<8x32xf32> to vector<8xf32>
    %243 = vector.shape_cast %242 : vector<8xf32> to vector<8x1xf32>
    %cst_169 = arith.constant 3.200000e+01 : f32
    %244 = vector.broadcast %cst_169 : f32 to vector<8x1xf32>
    %245 = arith.divf %243, %244 : vector<8x1xf32>
    %246 = vector.broadcast %245 : vector<8x1xf32> to vector<8x32xf32>
    %247 = arith.subf %239, %246 : vector<8x32xf32>
    %248 = vector.broadcast %245 : vector<8x1xf32> to vector<8x32xf32>
    %249 = arith.subf %239, %248 : vector<8x32xf32>
    %250 = arith.mulf %247, %249 : vector<8x32xf32>
    %cst_170 = arith.constant dense<0.000000e+00> : vector<8xf32>
    %251 = vector.multi_reduction <add>, %250, %cst_170 [1] : vector<8x32xf32> to vector<8xf32>
    %252 = vector.shape_cast %251 : vector<8xf32> to vector<8x1xf32>
    %cst_171 = arith.constant 3.200000e+01 : f32
    %253 = vector.broadcast %cst_171 : f32 to vector<8x1xf32>
    %254 = arith.divf %252, %253 : vector<8x1xf32>
    %255 = vector.broadcast %245 : vector<8x1xf32> to vector<8x32xf32>
    %256 = arith.subf %239, %255 : vector<8x32xf32>
    %cst_172 = arith.constant 9.99999996E-13 : f32
    %257 = vector.broadcast %cst_172 : f32 to vector<8x1xf32>
    %258 = arith.addf %254, %257 : vector<8x1xf32>
    %259 = math.rsqrt %258 : vector<8x1xf32>
    %260 = vector.broadcast %259 : vector<8x1xf32> to vector<8x32xf32>
    %261 = arith.mulf %256, %260 : vector<8x32xf32>
    %262 = vector.broadcast %240 : vector<1x32xf32> to vector<8x32xf32>
    %263 = arith.mulf %261, %262 : vector<8x32xf32>
    %264 = vector.broadcast %241 : vector<1x32xf32> to vector<8x32xf32>
    %265 = arith.addf %263, %264 : vector<8x32xf32>
    %c0_173 = arith.constant 0 : index
    %c0_174 = arith.constant 0 : index
    %266 = vector.load %arg16[%c0_173, %c0_174] : memref<8x32xf32, #tpu.memory_space<vmem>>, vector<8x32xf32>
    tpu.vector_store %arg16[%c0_173, %c0_174], %265 {strides = array<i32>} : memref<8x32xf32, #tpu.memory_space<vmem>>, vector<8x32xf32>,
    %c1_i32 = arith.constant 1 : i32
    %267 = arith.cmpi eq, %arg1, %c1_i32 : i32
    %268 = arith.extui %267 : i1 to i32
    %c0_i32_175 = arith.constant 0 : i32
    %269 = arith.cmpi ne, %268, %c0_i32_175 : i32
    scf.if %269 {
      %c0_176 = arith.constant 0 : index
      %c0_177 = arith.constant 0 : index
      %c0_178 = arith.constant 0 : index
      %270 = vector.load %arg15[%c0_176, %c0_177, %c0_178] : memref<1x8x32xf32, #tpu.memory_space<vmem>>, vector<1x8x32xf32>
      %271 = vector.shape_cast %270 : vector<1x8x32xf32> to vector<8x32xf32>
      %272 = vector.shape_cast %265 : vector<8x32xf32> to vector<1x8x32xf32>
      tpu.vector_store %arg15[%c0_176, %c0_177, %c0_178], %272 {strides = array<i32>} : memref<1x8x32xf32, #tpu.memory_space<vmem>>, vector<1x8x32xf32>,
    } else {
    }
    return
  }
  func.func @transform_0(%arg0: i32, %arg1: i32) -> (i32, i32, i32) {
    %c0_i32 = arith.constant 0 : i32
    %c0_i32_0 = arith.constant 0 : i32
    %c0_i32_1 = arith.constant 0 : i32
    return %arg0, %c0_i32, %c0_i32_0 : i32, i32, i32
  }
  func.func @transform_1(%arg0: i32, %arg1: i32) -> (i32, i32, i32) {
    %c0_i32 = arith.constant 0 : i32
    %c0_i32_0 = arith.constant 0 : i32
    %c0_i32_1 = arith.constant 0 : i32
    return %arg0, %c0_i32, %c0_i32_0 : i32, i32, i32
  }
  func.func @transform_2(%arg0: i32, %arg1: i32) -> (i32, i32, i32, i32) {
    %c0_i32 = arith.constant 0 : i32
    %c0_i32_0 = arith.constant 0 : i32
    %c0_i32_1 = arith.constant 0 : i32
    %c0_i32_2 = arith.constant 0 : i32
    return %arg1, %c0_i32, %c0_i32_0, %c0_i32_1 : i32, i32, i32, i32
  }
  func.func @transform_3(%arg0: i32, %arg1: i32) -> (i32, i32, i32, i32) {
    %c0_i32 = arith.constant 0 : i32
    %c0_i32_0 = arith.constant 0 : i32
    %c0_i32_1 = arith.constant 0 : i32
    %c0_i32_2 = arith.constant 0 : i32
    return %arg1, %c0_i32, %c0_i32_0, %c0_i32_1 : i32, i32, i32, i32
  }
  func.func @transform_4(%arg0: i32, %arg1: i32) -> (i32, i32, i32, i32) {
    %c0_i32 = arith.constant 0 : i32
    %c0_i32_0 = arith.constant 0 : i32
    %c0_i32_1 = arith.constant 0 : i32
    %c0_i32_2 = arith.constant 0 : i32
    return %arg1, %c0_i32, %c0_i32_0, %c0_i32_1 : i32, i32, i32, i32
  }
  func.func @transform_5(%arg0: i32, %arg1: i32) -> (i32, i32, i32, i32) {
    %c0_i32 = arith.constant 0 : i32
    %c0_i32_0 = arith.constant 0 : i32
    %c0_i32_1 = arith.constant 0 : i32
    %c0_i32_2 = arith.constant 0 : i32
    return %arg1, %c0_i32, %c0_i32_0, %c0_i32_1 : i32, i32, i32, i32
  }
  func.func @transform_6(%arg0: i32, %arg1: i32) -> (i32, i32, i32, i32) {
    %c0_i32 = arith.constant 0 : i32
    %c0_i32_0 = arith.constant 0 : i32
    %c0_i32_1 = arith.constant 0 : i32
    %c0_i32_2 = arith.constant 0 : i32
    return %arg1, %c0_i32, %c0_i32_0, %c0_i32_1 : i32, i32, i32, i32
  }
  func.func @transform_7(%arg0: i32, %arg1: i32) -> (i32, i32, i32, i32) {
    %c0_i32 = arith.constant 0 : i32
    %c0_i32_0 = arith.constant 0 : i32
    %c0_i32_1 = arith.constant 0 : i32
    %c0_i32_2 = arith.constant 0 : i32
    return %arg1, %c0_i32, %c0_i32_0, %c0_i32_1 : i32, i32, i32, i32
  }
  func.func @transform_8(%arg0: i32, %arg1: i32) -> (i32, i32, i32, i32) {
    %c0_i32 = arith.constant 0 : i32
    %c0_i32_0 = arith.constant 0 : i32
    %c0_i32_1 = arith.constant 0 : i32
    %c0_i32_2 = arith.constant 0 : i32
    return %arg1, %c0_i32, %c0_i32_0, %c0_i32_1 : i32, i32, i32, i32
  }
  func.func @transform_9(%arg0: i32, %arg1: i32) -> (i32, i32, i32) {
    %c0_i32 = arith.constant 0 : i32
    %c0_i32_0 = arith.constant 0 : i32
    %c0_i32_1 = arith.constant 0 : i32
    return %arg1, %c0_i32, %c0_i32_0 : i32, i32, i32
  }
  func.func @transform_10(%arg0: i32, %arg1: i32) -> (i32, i32, i32) {
    %c0_i32 = arith.constant 0 : i32
    %c0_i32_0 = arith.constant 0 : i32
    %c0_i32_1 = arith.constant 0 : i32
    return %arg1, %c0_i32, %c0_i32_0 : i32, i32, i32
  }
  func.func @transform_11(%arg0: i32, %arg1: i32) -> (i32, i32, i32) {
    %c0_i32 = arith.constant 0 : i32
    %c0_i32_0 = arith.constant 0 : i32
    %c0_i32_1 = arith.constant 0 : i32
    return %arg1, %c0_i32, %c0_i32_0 : i32, i32, i32
  }
  func.func @transform_12(%arg0: i32, %arg1: i32) -> (i32, i32, i32) {
    %c0_i32 = arith.constant 0 : i32
    %c0_i32_0 = arith.constant 0 : i32
    %c0_i32_1 = arith.constant 0 : i32
    return %arg1, %c0_i32, %c0_i32_0 : i32, i32, i32
  }
  func.func @transform_13(%arg0: i32, %arg1: i32) -> (i32, i32, i32) {
    %c0_i32 = arith.constant 0 : i32
    %c0_i32_0 = arith.constant 0 : i32
    %c0_i32_1 = arith.constant 0 : i32
    return %arg0, %c0_i32, %c0_i32_0 : i32, i32, i32
  }
}

</mosaic_0001>

<bundles_post_ra>
// kernel: bert_encoder_pallas.1
= control target key start
LH: loop header
LB: loop body
LE: loop exit
PB: predicated region body
PF: predicated region fallthrough
CT: control target
= control target key end

     0   :  { %s3677_s0 = inlined_call_operand.vmem [shape: f32[2,8,32], index: 0, kind: input, shape index: {}]   ;;  %s3678_s1 = inlined_call_operand.vmem [shape: f32[2,1,8], index: 1, kind: input, shape index: {}]   ;;  %s3679_s2 = inlined_call_operand.vmem [shape: bf16[2,4,32,8], index: 2, kind: input, shape index: {}]   ;;  %s3680_s3 = inlined_call_operand.vmem [shape: bf16[2,4,32,8], index: 3, kind: input, shape index: {}]   ;;  %s3681_s4 = inlined_call_operand.vmem [shape: bf16[2,4,32,8], index: 4, kind: input, shape index: {}]   ;;  %s3682_s5 = inlined_call_operand.vmem [shape: f32[2,4,1,8], index: 5, kind: input, shape index: {}]   ;;  %s3683_s6 = inlined_call_operand.vmem [shape: f32[2,4,1,8], index: 6, kind: input, shape index: {}]   ;;  %s3684_s7 = inlined_call_operand.vmem [shape: f32[2,4,1,8], index: 7, kind: input, shape index: {}]   ;;  %s3685_s8 = inlined_call_operand.vmem [shape: bf16[2,4,8,32], index: 8, kind: input, shape index: {}]   ;;  %s3686_s9 = inlined_call_operand.vmem [shape: bf16[2,32,64], index: 9, kind: input, shape index: {}]   ;;  %s3687_s10 = inlined_call_operand.vmem [shape: bf16[2,64,32], index: 10, kind: input, shape index: {}]   ;;  %s3688_s11 = inlined_call_operand.vmem [shape: f32[2,1,64], index: 11, kind: input, shape index: {}]   ;;  %s3689_s12 = inlined_call_operand.vmem [shape: f32[2,6,32], index: 12, kind: input, shape index: {}]   ;;  %s3690_s13 = inlined_call_operand.hbm [shape: f32[2,8,32], index: 13, kind: output, shape index: {}]  }
   0x1   :  { %3706 = sst [smem:[#allocation19_spill]] %s3677_s0 }
   0x2   :  { %3707 = sst [smem:[#allocation20_spill]] %s3678_s1 }
   0x3   :  { %3708 = sst [smem:[#allocation21_spill]] %s3679_s2 }
   0x4   :  { %3709 = sst [smem:[#allocation22_spill]] %s3680_s3 }
   0x5   :  { %3710 = sst [smem:[#allocation23_spill]] %s3681_s4 }
   0x6   :  { %3711 = sst [smem:[#allocation24_spill]] %s3682_s5 }
   0x7   :  { %3712 = sst [smem:[#allocation25_spill]] %s3683_s6 }
   0x8   :  { %3713 = sst [smem:[#allocation26_spill]] %s3684_s7 }
   0x9   :  { %3714 = sst [smem:[#allocation27_spill]] %s3685_s8 }
   0xa   :  { %3715 = sst [smem:[#allocation28_spill]] %s3690_s13 }
   0xb   :  { %18 = vsyncpa [#allocation4], 0 }
   0xc   :  { %20 = vsyncpa [#allocation4 + $0x1], 0  ;;  %s3223_s25 = smov 0   ;;  %s3225_s26 = smov 0  }
   0xd   :  { %s3227_s27 = smov 0   ;;  %s3229_s28 = smov 0  }
   0xe   :  { %s3231_s29 = smov 0   ;;  %s3233_s30 = smov 0  }
   0xf   :  { %s3235_s14 = smov 0   ;;  %s3237_s15 = smov 0  }
  0x10 LB: > { %3716 = sst [smem:[#allocation6_spill]] %s3120_s25  ;;  %s2522_s16 = sadd.s32 4294967295, %s3148_s15   ;;  %s3148_s15 = sphi %s3237_s15, %s26_s15   ;;  %s3144_s14 = sphi %s3235_s14, %s3758_s14   ;;  %s3140_s30 = sphi %s3233_s30, %s3757_s30   ;;  %s3136_s29 = sphi %s3231_s29, %s3756_s29   ;;  %s3132_s28 = sphi %s3229_s28, %s3755_s28   ;;  %s3128_s27 = sphi %s3227_s27, %s3754_s27   ;;  %s3124_s26 = sphi %s3225_s26, %s3753_s26   ;;  %s3120_s25 = sphi %s3223_s25, %s3752_s25  }
  0x11   : > { %3717 = sst [smem:[#allocation7_spill]] %s3124_s26  ;;  %s2523_s17 = sadd.s32 4294967294, %s3148_s15  }
  0x12   : > { %3718 = sst [smem:[#allocation8_spill]] %s3128_s27  ;;  %s35_s18 = sadd.s32 1, %s3140_s30 }
  0x13   : > { %3719 = sst [smem:[#allocation9_spill]] %s3132_s28  ;;  %p36_p0 = scmp.ge.s32.totalorder %s35_s18, 2 }
  0x14   : > { %3720 = sst [smem:[#allocation10_spill]] %s3136_s29  ;;  %s38_s19 = sadd.s32 1, %s3144_s14 }
  0x15   : > { %3721 = sst [smem:[#allocation11_spill]] %s3140_s30  ;;  %p393_p1 = scmp.ne.s32.totalorder %s3128_s27, %s3124_s26 }
  0x16   : > { %3722 = sst [smem:[#allocation12_spill]] %s3144_s14  ;;  %p394_p2 = scmp.eq.s32.totalorder %s2522_s16, 3 }
  0x17   : > { %3723 = sst [smem:[#allocation13_spill]] %s3148_s15  ;;  %s3760_s18 = smov (%p36_p0, %s35_s18), 0 }
  0x18   : > { %3724 = sst [smem:[#allocation14_spill]] %s3760_s18  ;;  %s3762_s19 = smov (!%p36_p0, %s38_s19), %s3144_s14 }
  0x19   : > { %p3272_p3 = por %p394_p2, %p393_p1  ;;  %p399_p4 = scmp.ne.s32.totalorder %s3124_s26, %s3120_s25 }
  0x1a   : > { %p40_p5 = scmp.ge.s32.totalorder %s3762_s19, 2  ;;  %p400_p6 = scmp.eq.s32.totalorder %s2523_s17, 3 }
  0x1b   : > { %s3725_s20 = scalar_select %p3272_p3, 1, 0 }
  0x1c   : > { %p2526_p7 = scmp.ge.s32.totalorder %s3148_s15, 1  ;;  %p513_p8 = scmp.lt.s32.totalorder %s3148_s15, 5 }
  0x1d   : > { %3726 = sst [smem:[#allocation15_spill]] %s3725_s20  ;;  %s3764_s19 = smov (%p40_p5, %s3762_s19), 0 }
  0x1e   : > { %3727 = sst [smem:[#allocation16_spill]] %s3764_s19  ;;  %p3282_p9 = por %p400_p6, %p399_p4 }
  0x1f   : > { %p514_p10 = pnand %p2526_p7, %p513_p8  ;;  %s380_s22 = ssub.s32 %s3144_s14, %s3764_s19 }
  0x20   : > { %s3728_s21 = scalar_select %p3282_p9, 1, 0 }
  0x21   : > { %s383_s23 = sadd.s32 1, %s3128_s27  ;;  %p381_p11 = scmp.eq.s32.totalorder %s380_s22, 0 }
  0x22   : > { %3729 = sst [smem:[#allocation17_spill]] %s3728_s21  ;;  %517 = sbr.rel (%p514_p10) target bundleno = 4179 (0x1053), region = 72 }
  0x23   : > { %s3290_s24 = scalar_select %p381_p11, %s3128_s27, %s383_s23  }
  0x24   : > { %s3694_s16 = sand.u32 (!%p514_p10), 1, %s3124_s26   ;;  %p608_p12 = scmp.lt.s32.totalorder (!%p514_p10), %s3136_s29, 1 }
  0x25   : > { %3730 = sst [smem:[#allocation18_spill]] %s3290_s24  ;;  %s3296_s17 = sshll.u32 (!%p514_p10), %s3694_s16, 3 }
  0x26   : > { %p615_p13 = scmp.lt.s32.totalorder (!%p514_p10), %s3132_s28, 1  ;;  %s3732_s0 = sld [smem:[#allocation19_spill]] (!%p514_p10) }
  0x27   : > { %s3300_s18 = scalar_select %p608_p12, %s3136_s29, 1 }
  0x28   : > { %s3303_s22 = scalar_select %p615_p13, %s3132_s28, 1 }
  0x29   : > { %s2528_s23 = sshll.u32 %s3300_s18, 3  ;;  %s3733_s2 = sld [smem:[#allocation21_spill]] }
  0x2a   : > { %s2669_s21 = sshll.u32 %s3303_s22, 6  ;;  %s3734_s3 = sld [smem:[#allocation22_spill]] }
  0x2b   : > { %s3735_s4 = sld [smem:[#allocation23_spill]]  ;;  %s2535_s24 = sshll.u32 %s3303_s22, 2 }
  0x2c   : > { %s611_s27 = scalar_lea.vmem %s3732_s0, %s2528_s23  ;;  %s3736_s5 = sld [smem:[#allocation24_spill]] }
  0x2d   : > { %s3737_s6 = sld [smem:[#allocation25_spill]]  ;;  %s2544_s26 = sshll.u32 %s3303_s22, 3 }
  0x2e   : > { %s3738_s7 = sld [smem:[#allocation26_spill]] }
  0x2f   : > { %s3317_s13 = scalar_lea.vmem %s3733_s2, %s2669_s21  ;;  %s3739_s8 = sld [smem:[#allocation27_spill]] }
  0x30   : > { %s3322_s29 = scalar_lea.vmem %s3734_s3, %s2669_s21  ;;  %s2672_s3 = sshll.u32 %s3303_s22, 4 }
  0x31   : > { %s3327_s19 = scalar_lea.vmem %s3735_s4, %s2669_s21  ;;  %s3354_s23 = scalar_lea.vmem %s3686_s9, %s2672_s3 }
  0x32   : > { %s3333_s30 = scalar_lea.vmem %s3736_s5, %s2535_s24  ;;  %s2674_s5 = sshll.u32 %s3303_s22, 5 }
  0x33   : > { %s3338_s0 = scalar_lea.vmem %s3737_s6, %s2535_s24  ;;  %s659_s6 = scalar_lea.vmem %s3688_s11, %s3303_s22 }
  0x34   : > { %s3343_s20 = scalar_lea.vmem %s3738_s7, %s2535_s24  ;;  %s3364_s24 = scalar_lea.vmem %s3687_s10, %s2674_s5 }
  0x35   : > { %s3349_s14 = scalar_lea.vmem %s3739_s8, %s2672_s3  ;;  %s3370_s21 = scalar_lea.vmem %s3689_s12, %s2544_s26 }
  0x36   : > { %s607_s8 = scalar_lea.vmem [#allocation3], %s3296_s17  ;;  %s3740_s4 = sld [smem:[#allocation9_spill]] }
  0x3c   : > { %p2545_p0 = scmp.ne.s32.totalorder %s3740_s4, 0 }
  0x3e   : > { %668 = sbr.rel (%p2545_p0) target bundleno = 69 (0x45), region = 76 }
  0x43   : > { %v669_v0 = vld [vmem:[%s611_s27] sm:$0xff]  ;;  %vm670_vm0 = vcmask 261120  }
  0x44   : > { %671 = vst.msk [vmem:[#allocation2] sm:$0xff] %vm670_vm0, %v669_v0 }
  0x45 PF: > { %v3004_v1 = vld [vmem:[%s3322_s29 + $0x8] sm:$0xff]   ;;  %v3150_v2 = vmov 0.0   ;;  %v3006_v4 = vld [vmem:[%s3322_s29] sm:$0xff]   ;;  %vm3151_vm1 = vmmov 0   ;;  %vm699_vm2 = vcmask 261120   ;;  %vm877_vm3 = vcmask 64512  }
  0x46   : > { %2751 = vmatprep.subr.bf16.mxu1 %v3150_v2  ;;  %2743 = vmatprep.subr.bf16.mxu0 %v3150_v2  ;;  %v3005_v3 = vld [vmem:[%s3317_s13 + $0x8] sm:$0xff]   ;;  %v3007_v5 = vld [vmem:[%s3317_s13] sm:$0xff]   ;;  %s3741_s5 = sld [smem:[#allocation20_spill]]  ;;  %vm938_vm4 = vcmask 1043456   ;;  %v3011_v40 = vld [vmem:[%s3317_s13 + $0x18] sm:$0xff]   ;;  %vm2226_vm5 = vcmask 523264  }
  0x47   : > { %2752 = vmatpush3.bf16.msra.mxu1 %v3004_v1  ;;  %2755 = vmatprep.mubr.msk.bf16.mxu1 %vm3151_vm1, %v3150_v2  ;;  %v3008_v8 = vld [vmem:[%s3327_s19 + $0x8] sm:$0xff]   ;;  %v3009_v9 = vld [vmem:[%s3327_s19] sm:$0xff]   ;;  %v3013_v41 = vld [vmem:[%s3317_s13 + $0x10] sm:$0xff]  }
  0x48   : > { %2744 = vmatpush3.bf16.msra.mxu0 %v3005_v3  ;;  %2753 = vmatprep.subr.bf16.mxu1 %v3150_v2  ;;  %v2550_v10 = vld [vmem:[%s3338_s0] ss:$0 sm:$0xff]  ;;  %v3010_v46 = vld [vmem:[%s3322_s29 + $0x18] sm:$0xff]   ;;  %v3012_v49 = vld [vmem:[%s3322_s29 + $0x10] sm:$0xff]  }
  0x49   : > { %2745 = vmatprep.subr.bf16.mxu0 %v3150_v2  ;;  %2747 = vmatprep.mubr.msk.bf16.mxu0 %vm3151_vm1, %v3150_v2  ;;  %v2546_v14 = vld [vmem:[%s3333_s30] ss:$0 sm:$0xff]  ;;  %v3014_v54 = vld [vmem:[%s3327_s19 + $0x18] sm:$0xff]   ;;  %v3015_v55 = vld [vmem:[%s3327_s19 + $0x10] sm:$0xff]  }
  0x4a   : > { %v2554_v32 = vld [vmem:[%s3343_s20] ss:$0 sm:$0xff]  ;;  %v2575_v60 = vld [vmem:[%s3338_s0 + $0x1] ss:$0 sm:$0xff] }
  0x4b   : > { %v3384_v6 = vld [vmem:[#allocation2] sm:$0xff]  ;;  %2754 = vmatpush3.bf16.msra.mxu1 %v3006_v4 }
  0x4c   : > { %v3390_v7 = vpack.c.bf16 %v3384_v6, %v3384_v6  ;;  %2746 = vmatpush3.bf16.msra.mxu0 %v3007_v5  ;;  %2767 = vmatprep.subr.bf16.mxu1 %v3150_v2  ;;  %s3742_s7 = scalar_lea.vmem %s3741_s5, %s3300_s18  ;;  %v2566_v63 = vld [vmem:[%s3333_s30 + $0x1] ss:$0 sm:$0xff] }
  0x4d   : > { %2759 = vmatprep.subr.bf16.mxu0 %v3150_v2  ;;  %v3422_v25 = vld [vmem:[%s3742_s7] ss:$0 sm:$0xff] }
  0x4e   : > { %2756 = vmatmul.mubr.msk.bf16.vlgmr.msra.gmra.mxu1 %vm699_vm2, %v3390_v7 }
  0x4f   : > { %2748 = vmatmul.mubr.msk.bf16.vlgmr.msra.gmra.mxu0 %vm699_vm2, %v3390_v7  ;;  %2769 = vmatprep.mubr.msk.bf16.mxu1 %vm3151_vm1, %v3150_v2 }
  0x50   : > { %2763 = vmatprep.mubr.msk.bf16.mxu0 %vm3151_vm1, %v3150_v2  ;;  %2760 = vmatpush3.bf16.msra.mxu0 %v3008_v8 }
  0x51   : > { %2761 = vmatprep.subr.bf16.mxu0 %v3150_v2 }
  0x54   : > { %2762 = vmatpush3.bf16.msra.mxu0 %v3009_v9 }
  0x55   : > { %2773 = vmatprep.subr.bf16.mxu0 %v3150_v2 }
  0x57   : > { %2764 = vmatmul.mubr.msk.bf16.vlgmr.msra.gmra.mxu0 %vm699_vm2, %v3390_v7 }
  0x58   : > { %2775 = vmatprep.mubr.msk.bf16.mxu0 %vm3151_vm1, %v3150_v2 }
 0x10e   : > { %v800_v11 = vpop.f32.mrf.mxu1 }
 0x10f   : > { %v801_v12 = vadd.f32 %v2550_v10, %v800_v11  ;;  %v737_v13 = vpop.f32.mrf.mxu0 }
 0x110   : > { %v2757_v15 = vpop.f32.mrf.mxu1  ;;  %v738_v20 = vadd.f32 %v2546_v14, %v737_v13 }
 0x111   : > { %v870_v16 = vpack.c.bf16 %v801_v12, %v801_v12  ;;  %v2749_v17 = vpop.f32.mrf.mxu0 }
 0x112   : > { %v803_v18 = vpop.f32.mrf.mxu1  ;;  %v869_v24 = vpack.c.bf16 %v738_v20, %v738_v20 }
 0x113   : > { %v882_v19 = vsel %vm877_vm3, %v870_v16, 0  ;;  %v740_v21 = vpop.f32.mrf.mxu0  ;;  %v2584_v16 = vld [vmem:[%s3343_s20 + $0x1] ss:$0 sm:$0xff] }
 0x114   : > { %v2758_v22 = vpop.f32.mrf.mxu1  ;;  %2768 = vmatpush3.bf16.xpose.msra.mxu1 %v882_v19 }
 0x115   : > { %v2750_v23 = vpop.f32.mrf.mxu0  ;;  %2779 = vmatprep.subr.bf16.mxu1 %v3150_v2 }
 0x117   : > { %v863_v33 = vpop.f32.mrf.mxu0 }
 0x118   : > { %v864_v34 = vadd.f32 %v2554_v32, %v863_v33 }
 0x119   : > { %v2765_v35 = vpop.f32.mrf.mxu0 }
 0x11a   : > { %v934_v36 = vpack.c.bf16 %v864_v34, %v864_v34 }
 0x11b   : > { %2770 = vmatmul.mubr.msk.bf16.vlgmr.msra.gmra.mxu1 %vm877_vm3, %v869_v24  ;;  %v866_v37 = vpop.f32.mrf.mxu0 }
 0x11c   : > { %2783 = vmatprep.mubr.msk.bf16.mxu1 %vm3151_vm1, %v3150_v2  ;;  %v940_v38 = vsel %vm938_vm4, %v934_v36, 0  ;;  %2780 = vmatpush3.bf16.msra.mxu1 %v3011_v40  ;;  %v3016_v37 = vld [vmem:[%s3322_s29 + $0x28] sm:$0xff]   ;;  %v3017_v40 = vld [vmem:[%s3322_s29 + $0x20] sm:$0xff]  }
 0x11d   : > { %v2766_v39 = vpop.f32.mrf.mxu0  ;;  %2774 = vmatpush3.bf16.msra.mxu0 %v940_v38  ;;  %2781 = vmatprep.subr.bf16.mxu1 %v3150_v2  ;;  %v2590_v38 = vld [vmem:[%s3349_s14 + $0x4] sm:$0xf] }
 0x11e   : > { %2787 = vmatprep.subr.bf16.mxu0 %v3150_v2  ;;  %v1295_v39 = vsel %vm938_vm4, %v2590_v38, 0  ;;  %v3023_v38 = vld [vmem:[%s3317_s13 + $0x38] sm:$0xff]  }
 0x120   : > { %2782 = vmatpush3.bf16.msra.mxu1 %v3013_v41 }
 0x121   : > { %2795 = vmatprep.subr.bf16.mxu1 %v3150_v2 }
 0x123   : > { %2784 = vmatmul.mubr.msk.bf16.vlgmr.msra.gmra.mxu1 %vm699_vm2, %v3390_v7 }
 0x124   : > { %2799 = vmatprep.mubr.msk.bf16.mxu1 %vm3151_vm1, %v3150_v2  ;;  %2796 = vmatpush3.bf16.msra.mxu1 %v3014_v54 }
 0x125   : > { %2797 = vmatprep.subr.bf16.mxu1 %v3150_v2 }
 0x128   : > { %2798 = vmatpush3.bf16.msra.mxu1 %v3015_v55  ;;  %v2607_v55 = vld [vmem:[%s3338_s0 + $0x2] ss:$0 sm:$0xff] }
 0x129   : > { %2809 = vmatprep.subr.bf16.mxu1 %v3150_v2 }
 0x12b   : > { %2800 = vmatmul.mubr.msk.bf16.vlgmr.msra.gmra.mxu1 %vm699_vm2, %v3390_v7 }
 0x12c   : > { %2811 = vmatprep.mubr.msk.bf16.mxu1 %vm3151_vm1, %v3150_v2 }
 0x1db   : > { %v918_v26 = vpop.f32.mrf.mxu1 }
 0x1dc   : > { %v919_v27 = vadd.f32 %v3422_v25, %v918_v26 }
 0x1dd   : > { %v2771_v28 = vpop.f32.mrf.mxu1 }
 0x1de   : > { %v924_v29 = vsel %vm877_vm3, %v919_v27, -inf }
 0x1df   : > { %925 = vmax.xlane.f32.xlu0 %v924_v29  ;;  %v921_v30 = vpop.f32.mrf.mxu1  ;;  %v985_v29 = vld [vmem:[%s3349_s14] sm:$0xf] }
 0x1e0   : > { %v1341_v33 = vsel %vm938_vm4, %v985_v29, 0 }
 0x1e1   : > { %v2772_v31 = vpop.f32.mrf.mxu1 }
 0x1e3   : > { %v1045_v50 = vpop.f32.mrf.mxu1 }
 0x1e4   : > { %v1046_v5 = vadd.f32 %v2566_v63, %v1045_v50  ;;  %v3019_v50 = vld [vmem:[%s3317_s13 + $0x20] sm:$0xff]   ;;  %v3020_v63 = vld [vmem:[%s3327_s19 + $0x28] sm:$0xff]  }
 0x1e5   : > { %v2785_v51 = vpop.f32.mrf.mxu1 }
 0x1e6   : > { %v1181_v9 = vpack.c.bf16 %v1046_v5, %v1046_v5 }
 0x1e7   : > { %v1048_v52 = vpop.f32.mrf.mxu1 }
 0x1e9   : > { %v2786_v53 = vpop.f32.mrf.mxu1 }
 0x1eb   : > { %v1175_v17 = vpop.f32.mrf.mxu1 }
 0x1ec   : > { %v1176_v18 = vadd.f32 %v2584_v16, %v1175_v17 }
 0x1ed   : > { %v2801_v19 = vpop.f32.mrf.mxu1 }
 0x1ee   : > { %v1239_v20 = vpack.c.bf16 %v1176_v18, %v1176_v18 }
 0x1ef   : > { %v1178_v21 = vpop.f32.mrf.mxu1 }
 0x1f0   : > { %v1244_v22 = vsel %vm938_vm4, %v1239_v20, 0  ;;  %v2616_v21 = vld [vmem:[%s3343_s20 + $0x2] ss:$0 sm:$0xff] }
 0x1f1   : > { %v2802_v23 = vpop.f32.mrf.mxu1  ;;  %2810 = vmatpush3.bf16.msra.mxu1 %v1244_v22 }
 0x1f2   : > { %2821 = vmatprep.subr.bf16.mxu1 %v3150_v2 }
 0x268   : > { %v926_v42 = vpop.xlane.xlu0 %925 }
 0x269   : > { %v927_v43 = vsub.f32 %v919_v27, %v926_v42 }
 0x26b   : > { %v928_v44 = vmul.f32 1.442695, %v927_v43 }
 0x26d   : > { %3034 = vpow2.f32 %v928_v44 }
 0x27a   : > { %v3035_v45 = vpop.eup %3034 }
 0x27b   : > { %v930_v47 = vsel %vm877_vm3, %v3035_v45, 0.0  ;;  %v933_v48 = vpack.c.bf16 %v3035_v45, %v3035_v45 }
 0x27c   : > { %931 = vadd.xlane.f32.xlu1 %v930_v47 }
 0x27d   : > { %2776 = vmatmul.mubr.msk.bf16.vlgmr.msra.gmra.mxu0 %vm877_vm3, %v933_v48 }
 0x27e   : > { %2788 = vmatpush3.bf16.msra.mxu0 %v3010_v46  ;;  %2791 = vmatprep.mubr.msk.bf16.mxu0 %vm3151_vm1, %v3150_v2  ;;  %v3018_v46 = vld [vmem:[%s3317_s13 + $0x28] sm:$0xff]  }
 0x27f   : > { %2789 = vmatprep.subr.bf16.mxu0 %v3150_v2 }
 0x282   : > { %2790 = vmatpush3.bf16.msra.mxu0 %v3012_v49 }
 0x283   : > { %2803 = vmatprep.subr.bf16.mxu0 %v3150_v2 }
 0x285   : > { %2792 = vmatmul.mubr.msk.bf16.vlgmr.msra.gmra.mxu0 %vm699_vm2, %v3390_v7 }
 0x286   : > { %2805 = vmatprep.mubr.msk.bf16.mxu0 %vm3151_vm1, %v3150_v2 }
 0x305   : > { %v932_v28 = vpop.xlane.xlu1 %931 }
 0x33d   : > { %v976_v56 = vpop.f32.mrf.mxu0 }
 0x33f   : > { %v2777_v57 = vpop.f32.mrf.mxu0 }
 0x341   : > { %v979_v58 = vpop.f32.mrf.mxu0 }
 0x343   : > { %v2778_v59 = vpop.f32.mrf.mxu0 }
 0x345   : > { %v1110_v61 = vpop.f32.mrf.mxu0 }
 0x346   : > { %v1111_v62 = vadd.f32 %v2575_v60, %v1110_v61 }
 0x347   : > { %v2793_v0 = vpop.f32.mrf.mxu0 }
 0x348   : > { %v1182_v1 = vpack.c.bf16 %v1111_v62, %v1111_v62  ;;  %v3021_v0 = vld [vmem:[%s3327_s19 + $0x20] sm:$0xff]  }
 0x349   : > { %v1113_v3 = vpop.f32.mrf.mxu0 }
 0x34a   : > { %v1187_v4 = vsel %vm877_vm3, %v1182_v1, 0 }
 0x34b   : > { %v2794_v8 = vpop.f32.mrf.mxu0  ;;  %2804 = vmatpush3.bf16.xpose.msra.mxu0 %v1187_v4 }
 0x34c   : > { %2815 = vmatprep.subr.bf16.mxu0 %v3150_v2  ;;  %v2598_v8 = vld [vmem:[%s3333_s30 + $0x2] ss:$0 sm:$0xff] }
 0x352   : > { %2806 = vmatmul.mubr.msk.bf16.vlgmr.msra.gmra.mxu0 %vm877_vm3, %v1181_v9 }
 0x353   : > { %2817 = vmatprep.mubr.msk.bf16.mxu0 %vm3151_vm1, %v3150_v2  ;;  %2816 = vmatpush3.bf16.msra.mxu0 %v1295_v39  ;;  %v3025_v39 = vld [vmem:[%s3317_s13 + $0x30] sm:$0xff]  }
 0x354   : > { %2827 = vmatprep.subr.bf16.mxu0 %v3150_v2 }
 0x412   : > { %v1223_v10 = vpop.f32.mrf.mxu0 }
 0x413   : > { %v1224_v11 = vadd.f32 %v3422_v25, %v1223_v10 }
 0x414   : > { %v2807_v12 = vpop.f32.mrf.mxu0 }
 0x415   : > { %v1229_v13 = vsel %vm877_vm3, %v1224_v11, -inf }
 0x416   : > { %1230 = vmax.xlane.f32.xlu0 %v1229_v13  ;;  %v1226_v14 = vpop.f32.mrf.mxu0 }
 0x418   : > { %v2808_v15 = vpop.f32.mrf.mxu0 }
 0x49f   : > { %v1231_v24 = vpop.xlane.xlu0 %1230 }
 0x4a0   : > { %v1232_v26 = vsub.f32 %v1224_v11, %v1231_v24 }
 0x4a2   : > { %v1233_v27 = vmul.f32 1.442695, %v1232_v26 }
 0x4a4   : > { %3036 = vpow2.f32 %v1233_v27 }
 0x4a5   : > { %3038 = vrcp.f32 %v932_v28 }
 0x4b1   : > { %v3037_v30 = vpop.eup %3036 }
 0x4b2   : > { %v1235_v31 = vsel %vm877_vm3, %v3037_v30, 0.0  ;;  %v1238_v32 = vpack.c.bf16 %v3037_v30, %v3037_v30  ;;  %v3039_v34 = vpop.eup %3038 }
 0x4b3   : > { %1236 = vadd.xlane.f32.xlu1 %v1235_v31  ;;  %v983_v35 = vmul.f32 %v3039_v34, %v976_v56 }
 0x4b4   : > { %2812 = vmatmul.mubr.msk.bf16.vlgmr.msra.gmra.mxu1 %vm877_vm3, %v1238_v32 }
 0x4b5   : > { %2822 = vmatpush3.bf16.msra.mxu1 %v1341_v33  ;;  %2823 = vmatprep.mubr.msk.bf16.mxu1 %vm3151_vm1, %v3150_v2  ;;  %v984_v36 = vpack.c.bf16 %v983_v35, %v983_v35 }
 0x4b6   : > { %2835 = vmatprep.subr.bf16.mxu1 %v3150_v2 }
 0x4bc   : > { %2824 = vmatmul.mubr.msk.bf16.vlgmr.msra.gmra.mxu1 %vm877_vm3, %v984_v36  ;;  %v2622_v36 = vld [vmem:[%s3349_s14 + $0x8] sm:$0xf] }
 0x4bd   : > { %2839 = vmatprep.mubr.msk.bf16.mxu1 %vm3151_vm1, %v3150_v2  ;;  %2836 = vmatpush3.bf16.msra.mxu1 %v3016_v37  ;;  %v1692_v37 = vsel %vm938_vm4, %v2622_v36, 0 }
 0x4be   : > { %2837 = vmatprep.subr.bf16.mxu1 %v3150_v2 }
 0x4c1   : > { %2838 = vmatpush3.bf16.msra.mxu1 %v3017_v40 }
 0x4c2   : > { %2851 = vmatprep.subr.bf16.mxu1 %v3150_v2 }
 0x4c4   : > { %2840 = vmatmul.mubr.msk.bf16.vlgmr.msra.gmra.mxu1 %vm699_vm2, %v3390_v7 }
 0x4c5   : > { %2853 = vmatprep.mubr.msk.bf16.mxu1 %vm3151_vm1, %v3150_v2 }
 0x53c   : > { %v1237_v41 = vpop.xlane.xlu1 %1236 }
 0x53d   : > { %3040 = vrcp.f32 %v1237_v41 }
 0x54a   : > { %v3041_v42 = vpop.eup %3040 }
 0x574   : > { %v1280_v43 = vpop.f32.mrf.mxu1 }
 0x575   : > { %v1287_v44 = vmul.f32 %v3041_v42, %v1280_v43 }
 0x576   : > { %v2813_v45 = vpop.f32.mrf.mxu1 }
 0x577   : > { %v1288_v47 = vpack.c.bf16 %v1287_v44, %v1287_v44  ;;  %v3022_v45 = vld [vmem:[%s3322_s29 + $0x38] sm:$0xff]  }
 0x578   : > { %v1283_v48 = vpop.f32.mrf.mxu1 }
 0x579   : > { %2818 = vmatmul.mubr.msk.bf16.vlgmr.msra.gmra.mxu0 %vm877_vm3, %v1288_v47 }
 0x57a   : > { %v2814_v49 = vpop.f32.mrf.mxu1  ;;  %2828 = vmatpush3.bf16.msra.mxu0 %v3018_v46  ;;  %2831 = vmatprep.mubr.msk.bf16.mxu0 %vm3151_vm1, %v3150_v2 }
 0x57b   : > { %2829 = vmatprep.subr.bf16.mxu0 %v3150_v2  ;;  %v3024_v49 = vld [vmem:[%s3322_s29 + $0x30] sm:$0xff]  }
 0x57c   : > { %v3496_v51 = vpop.f32.mrf.mxu1 }
 0x57e   : > { %v2825_v52 = vpop.f32.mrf.mxu1  ;;  %2830 = vmatpush3.bf16.msra.mxu0 %v3019_v50 }
 0x57f   : > { %2843 = vmatprep.subr.bf16.mxu0 %v3150_v2 }
 0x580   : > { %v1380_v53 = vpop.f32.mrf.mxu1 }
 0x581   : > { %2832 = vmatmul.mubr.msk.bf16.vlgmr.msra.gmra.mxu0 %vm699_vm2, %v3390_v7 }
 0x582   : > { %v2826_v54 = vpop.f32.mrf.mxu1  ;;  %2847 = vmatprep.mubr.msk.bf16.mxu0 %vm3151_vm1, %v3150_v2  ;;  %2844 = vmatpush3.bf16.msra.mxu0 %v3020_v63  ;;  %v2638_v63 = vld [vmem:[%s3338_s0 + $0x3] ss:$0 sm:$0xff] }
 0x583   : > { %2845 = vmatprep.subr.bf16.mxu0 %v3150_v2 }
 0x584   : > { %v1507_v56 = vpop.f32.mrf.mxu1 }
 0x585   : > { %v1508_v57 = vadd.f32 %v2607_v55, %v1507_v56  ;;  %v3026_v55 = vld [vmem:[%s3327_s19 + $0x38] sm:$0xff]   ;;  %v3027_v56 = vld [vmem:[%s3327_s19 + $0x30] sm:$0xff]  }
 0x586   : > { %v2841_v58 = vpop.f32.mrf.mxu1  ;;  %2846 = vmatpush3.bf16.msra.mxu0 %v3021_v0 }
 0x587   : > { %v1579_v59 = vpack.c.bf16 %v1508_v57, %v1508_v57  ;;  %2857 = vmatprep.subr.bf16.mxu0 %v3150_v2 }
 0x588   : > { %v1510_v60 = vpop.f32.mrf.mxu1 }
 0x589   : > { %v1584_v61 = vsel %vm877_vm3, %v1579_v59, 0  ;;  %2848 = vmatmul.mubr.msk.bf16.vlgmr.msra.gmra.mxu0 %vm699_vm2, %v3390_v7 }
 0x58a   : > { %v2842_v62 = vpop.f32.mrf.mxu1  ;;  %2852 = vmatpush3.bf16.xpose.msra.mxu1 %v1584_v61  ;;  %2859 = vmatprep.mubr.msk.bf16.mxu0 %vm3151_vm1, %v3150_v2 }
 0x58b   : > { %2863 = vmatprep.subr.bf16.mxu1 %v3150_v2 }
 0x639   : > { %v3514_v1 = vpop.f32.mrf.mxu0 }
 0x63a   : > { %v1378_v57 = vadd.f32 %v3496_v51, %v3514_v1 }
 0x63b   : > { %v2819_v3 = vpop.f32.mrf.mxu0 }
 0x63d   : > { %v1334_v4 = vpop.f32.mrf.mxu0 }
 0x63f   : > { %v2820_v5 = vpop.f32.mrf.mxu0 }
 0x640   : > { %v2629_v5 = vld [vmem:[%s3333_s30 + $0x3] ss:$0 sm:$0xff] }
 0x641   : > { %v1442_v9 = vpop.f32.mrf.mxu0 }
 0x642   : > { %v1443_v10 = vadd.f32 %v2598_v8, %v1442_v9 }
 0x643   : > { %v2833_v11 = vpop.f32.mrf.mxu0 }
 0x644   : > { %v1578_v12 = vpack.c.bf16 %v1443_v10, %v1443_v10 }
 0x645   : > { %v1445_v13 = vpop.f32.mrf.mxu0 }
 0x646   : > { %2854 = vmatmul.mubr.msk.bf16.vlgmr.msra.gmra.mxu1 %vm877_vm3, %v1578_v12 }
 0x647   : > { %v2834_v14 = vpop.f32.mrf.mxu0  ;;  %2865 = vmatprep.mubr.msk.bf16.mxu1 %vm3151_vm1, %v3150_v2  ;;  %2864 = vmatpush3.bf16.msra.mxu1 %v1692_v37 }
 0x648   : > { %2877 = vmatprep.subr.bf16.mxu1 %v3150_v2 }
 0x649   : > { %v1572_v22 = vpop.f32.mrf.mxu0 }
 0x64a   : > { %v1573_v23 = vadd.f32 %v2616_v21, %v1572_v22 }
 0x64b   : > { %v2849_v24 = vpop.f32.mrf.mxu0 }
 0x64c   : > { %v1636_v26 = vpack.c.bf16 %v1573_v23, %v1573_v23 }
 0x64d   : > { %v1575_v27 = vpop.f32.mrf.mxu0 }
 0x64e   : > { %v1641_v28 = vsel %vm938_vm4, %v1636_v26, 0 }
 0x64f   : > { %v2850_v29 = vpop.f32.mrf.mxu0  ;;  %2858 = vmatpush3.bf16.msra.mxu0 %v1641_v28 }
 0x650   : > { %2869 = vmatprep.subr.bf16.mxu0 %v3150_v2 }
 0x706   : > { %v1620_v15 = vpop.f32.mrf.mxu1 }
 0x707   : > { %v1621_v16 = vadd.f32 %v3422_v25, %v1620_v15 }
 0x708   : > { %v2855_v17 = vpop.f32.mrf.mxu1 }
 0x709   : > { %v1626_v18 = vsel %vm877_vm3, %v1621_v16, -inf  ;;  %v2647_v17 = vld [vmem:[%s3343_s20 + $0x3] ss:$0 sm:$0xff] }
 0x70a   : > { %1627 = vmax.xlane.f32.xlu0 %v1626_v18  ;;  %v1623_v19 = vpop.f32.mrf.mxu1 }
 0x70c   : > { %v2856_v20 = vpop.f32.mrf.mxu1 }
 0x793   : > { %v1628_v30 = vpop.xlane.xlu0 %1627 }
 0x794   : > { %v1629_v31 = vsub.f32 %v1621_v16, %v1628_v30 }
 0x796   : > { %v1630_v32 = vmul.f32 1.442695, %v1629_v31  ;;  %v2653_v31 = vld [vmem:[%s3349_s14 + $0xc] sm:$0xf] }
 0x798   : > { %3042 = vpow2.f32 %v1630_v32  ;;  %v2044_v32 = vsel %vm938_vm4, %v2653_v31, 0 }
 0x7a5   : > { %v3043_v33 = vpop.eup %3042 }
 0x7a6   : > { %v1632_v34 = vsel %vm877_vm3, %v3043_v33, 0.0  ;;  %v1635_v35 = vpack.c.bf16 %v3043_v33, %v3043_v33 }
 0x7a7   : > { %1633 = vadd.xlane.f32.xlu1 %v1632_v34 }
 0x7a8   : > { %2860 = vmatmul.mubr.msk.bf16.vlgmr.msra.gmra.mxu0 %vm877_vm3, %v1635_v35 }
 0x7a9   : > { %2873 = vmatprep.mubr.msk.bf16.mxu0 %vm3151_vm1, %v3150_v2  ;;  %2870 = vmatpush3.bf16.msra.mxu0 %v3023_v38 }
 0x7aa   : > { %2871 = vmatprep.subr.bf16.mxu0 %v3150_v2 }
 0x7ad   : > { %2872 = vmatpush3.bf16.msra.mxu0 %v3025_v39 }
 0x7ae   : > { %2885 = vmatprep.subr.bf16.mxu0 %v3150_v2 }
 0x7b0   : > { %2874 = vmatmul.mubr.msk.bf16.vlgmr.msra.gmra.mxu0 %vm699_vm2, %v3390_v7 }
 0x7b1   : > { %2889 = vmatprep.mubr.msk.bf16.mxu0 %vm3151_vm1, %v3150_v2  ;;  %2886 = vmatpush3.bf16.msra.mxu0 %v3026_v55 }
 0x7b2   : > { %2887 = vmatprep.subr.bf16.mxu0 %v3150_v2 }
 0x7b5   : > { %2888 = vmatpush3.bf16.msra.mxu0 %v3027_v56 }
 0x7b6   : > { %2899 = vmatprep.subr.bf16.mxu0 %v3150_v2 }
 0x7b8   : > { %2890 = vmatmul.mubr.msk.bf16.vlgmr.msra.gmra.mxu0 %vm699_vm2, %v3390_v7 }
 0x7b9   : > { %2901 = vmatprep.mubr.msk.bf16.mxu0 %vm3151_vm1, %v3150_v2 }
 0x830   : > { %v1634_v40 = vpop.xlane.xlu1 %1633 }
 0x831   : > { %3044 = vrcp.f32 %v1634_v40 }
 0x83e   : > { %v3045_v41 = vpop.eup %3044 }
 0x868   : > { %v1677_v42 = vpop.f32.mrf.mxu0 }
 0x869   : > { %v1684_v43 = vmul.f32 %v3045_v41, %v1677_v42  ;;  %v2087_v41 = vlaneseq }
 0x86a   : > { %v2861_v44 = vpop.f32.mrf.mxu0 }
 0x86b   : > { %v1685_v46 = vpack.c.bf16 %v1684_v43, %v1684_v43  ;;  %v3585_v42 = vshrl.u32 %v2087_v41, 7  ;;  %v3589_v44 = vld [vmem:[%s3370_s21] sm:$0x3f] }
 0x86c   : > { %v1680_v47 = vpop.f32.mrf.mxu0 }
 0x86d   : > { %2866 = vmatmul.mubr.msk.bf16.vlgmr.msra.gmra.mxu1 %vm877_vm3, %v1685_v46  ;;  %v2089_v43 = vsub.s32 0, %v3585_v42 }
 0x86e   : > { %v2862_v48 = vpop.f32.mrf.mxu0  ;;  %2878 = vmatpush3.bf16.msra.mxu1 %v3022_v45  ;;  %2881 = vmatprep.mubr.msk.bf16.mxu1 %vm3151_vm1, %v3150_v2 }
 0x86f   : > { %2879 = vmatprep.subr.bf16.mxu1 %v3150_v2  ;;  %v2090_v45 = vrot.slane %v3589_v44, %v2089_v43  ;;  %v2286_v43 = vsub.s32 4, %v3585_v42 }
 0x870   : > { %v1794_v50 = vpop.f32.mrf.mxu0 }
 0x871   : > { %v1795_v10 = vadd.f32 %v2629_v5, %v1794_v50 }
 0x872   : > { %2880 = vmatpush3.bf16.msra.mxu1 %v3024_v49  ;;  %v2875_v52 = vpop.f32.mrf.mxu0 }
 0x873   : > { %2893 = vmatprep.subr.bf16.mxu1 %v3150_v2  ;;  %v1930_v51 = vpack.c.bf16 %v1795_v10, %v1795_v10 }
 0x874   : > { %v1797_v53 = vpop.f32.mrf.mxu0 }
 0x875   : > { %2882 = vmatmul.mubr.msk.bf16.vlgmr.msra.gmra.mxu1 %vm699_vm2, %v3390_v7 }
 0x876   : > { %2895 = vmatprep.mubr.msk.bf16.mxu1 %vm3151_vm1, %v3150_v2  ;;  %v2876_v54 = vpop.f32.mrf.mxu0 }
 0x878   : > { %v1924_v18 = vpop.f32.mrf.mxu0 }
 0x879   : > { %v1925_v19 = vadd.f32 %v2647_v17, %v1924_v18 }
 0x87a   : > { %v2891_v20 = vpop.f32.mrf.mxu0 }
 0x87b   : > { %v1988_v21 = vpack.c.bf16 %v1925_v19, %v1925_v19 }
 0x87c   : > { %v1927_v22 = vpop.f32.mrf.mxu0 }
 0x87d   : > { %v1993_v23 = vsel %vm938_vm4, %v1988_v21, 0 }
 0x87e   : > { %v2892_v24 = vpop.f32.mrf.mxu0  ;;  %2900 = vmatpush3.bf16.msra.mxu0 %v1993_v23 }
 0x87f   : > { %2911 = vmatprep.subr.bf16.mxu0 %v3150_v2 }
 0x92d   : > { %v1728_v58 = vpop.f32.mrf.mxu1 }
 0x92e   : > { %v3561_v59 = vadd.f32 %v1728_v58, %v1378_v57 }
 0x92f   : > { %v2867_v60 = vpop.f32.mrf.mxu1 }
 0x931   : > { %v1731_v61 = vpop.f32.mrf.mxu1 }
 0x932   : > { %v3028_v61 = vld [vmem:[%s3354_s23 + $0x8] sm:$0xff]  }
 0x933   : > { %v2868_v62 = vpop.f32.mrf.mxu1 }
 0x935   : > { %v1859_v0 = vpop.f32.mrf.mxu1 }
 0x936   : > { %v1860_v3 = vadd.f32 %v2638_v63, %v1859_v0  ;;  %v2109_v0 = vsub.s32 1, %v3585_v42 }
 0x937   : > { %v2883_v4 = vpop.f32.mrf.mxu1 }
 0x938   : > { %v1931_v8 = vpack.c.bf16 %v1860_v3, %v1860_v3  ;;  %v2114_v3 = vsub.s32 2, %v3585_v42  ;;  %v2110_v4 = vrot.slane %v3589_v44, %v2109_v0 }
 0x939   : > { %v1862_v9 = vpop.f32.mrf.mxu1 }
 0x93a   : > { %v1936_v7 = vsel %vm877_vm3, %v1931_v8, 0  ;;  %v2115_v9 = vrot.slane %v3589_v44, %v2114_v3 }
 0x93b   : > { %v2884_v11 = vpop.f32.mrf.mxu1  ;;  %2894 = vmatpush3.bf16.xpose.msra.mxu1 %v1936_v7 }
 0x93c   : > { %2905 = vmatprep.subr.bf16.mxu1 %v3150_v2 }
 0x942   : > { %2896 = vmatmul.mubr.msk.bf16.vlgmr.msra.gmra.mxu1 %vm877_vm3, %v1930_v51  ;;  %v3030_v51 = vld [vmem:[%s3364_s24 + $0x18] sm:$0xff]  }
 0x943   : > { %2907 = vmatprep.mubr.msk.bf16.mxu1 %vm3151_vm1, %v3150_v2  ;;  %2906 = vmatpush3.bf16.msra.mxu1 %v2044_v32 }
 0x944   : > { %2919 = vmatprep.subr.bf16.mxu1 %v3150_v2 }
 0xa02   : > { %v1972_v1 = vpop.f32.mrf.mxu1 }
 0xa03   : > { %v1973_v12 = vadd.f32 %v3422_v25, %v1972_v1  ;;  %v3031_v1 = vld [vmem:[%s3364_s24 + $0x10] sm:$0xff]  }
 0xa04   : > { %v2897_v13 = vpop.f32.mrf.mxu1 }
 0xa05   : > { %v1978_v14 = vsel %vm877_vm3, %v1973_v12, -inf  ;;  %v3033_v13 = vld [vmem:[%s3364_s24] sm:$0xff]  }
 0xa06   : > { %1979 = vmax.xlane.f32.xlu0 %v1978_v14  ;;  %v1975_v15 = vpop.f32.mrf.mxu1  ;;  %v2655_v14 = vld [vmem:[%s659_s6] ss:$0 sm:$0xff]  ;;  %s3743_s6 = sld [smem:[#allocation9_spill]] }
 0xa08   : > { %v2898_v16 = vpop.f32.mrf.mxu1 }
 0xa0c   : > { %p2664_p1 = scmp.ne.s32.totalorder %s3743_s6, 1 }
 0xa8f   : > { %v1980_v25 = vpop.xlane.xlu0 %1979 }
 0xa90   : > { %v1981_v26 = vsub.f32 %v1973_v12, %v1980_v25  ;;  %v3032_v12 = vld [vmem:[%s3364_s24 + $0x8] sm:$0xff]   ;;  %v2200_v25 = vsub.s32 3, %v3585_v42 }
 0xa92   : > { %v1982_v27 = vmul.f32 1.442695, %v1981_v26  ;;  %v2201_v26 = vrot.slane %v3589_v44, %v2200_v25 }
 0xa94   : > { %3046 = vpow2.f32 %v1982_v27 }
 0xaa1   : > { %v3047_v28 = vpop.eup %3046 }
 0xaa2   : > { %v1984_v29 = vsel %vm877_vm3, %v3047_v28, 0.0  ;;  %v1987_v30 = vpack.c.bf16 %v3047_v28, %v3047_v28 }
 0xaa3   : > { %1985 = vadd.xlane.f32.xlu1 %v1984_v29 }
 0xaa4   : > { %2902 = vmatmul.mubr.msk.bf16.vlgmr.msra.gmra.mxu0 %vm877_vm3, %v1987_v30 }
 0xaa5   : > { %2915 = vmatprep.mubr.msk.bf16.mxu0 %vm3151_vm1, %v3150_v2  ;;  %2912 = vmatpush3.bf16.msra.mxu0 %v3028_v61 }
 0xaa6   : > { %2913 = vmatprep.subr.bf16.mxu0 %v3150_v2 }
 0xb2c   : > { %v1986_v33 = vpop.xlane.xlu1 %1985 }
 0xb2d   : > { %3048 = vrcp.f32 %v1986_v33 }
 0xb3a   : > { %v3049_v34 = vpop.eup %3048 }
 0xb64   : > { %v2029_v35 = vpop.f32.mrf.mxu0 }
 0xb65   : > { %v2036_v36 = vmul.f32 %v3049_v34, %v2029_v35 }
 0xb66   : > { %v2903_v37 = vpop.f32.mrf.mxu0 }
 0xb67   : > { %v2037_v38 = vpack.c.bf16 %v2036_v36, %v2036_v36 }
 0xb68   : > { %v2032_v39 = vpop.f32.mrf.mxu0 }
 0xb69   : > { %2908 = vmatmul.mubr.msk.bf16.vlgmr.msra.gmra.mxu1 %vm877_vm3, %v2037_v38 }
 0xb6a   : > { %v2904_v40 = vpop.f32.mrf.mxu0  ;;  %2927 = vmatprep.mubr.msk.bf16.mxu1 %vm3151_vm1, %v3150_v2  ;;  %2920 = vmatpush3.bf16.msra.mxu1 %v3030_v51 }
 0xb6b   : > { %2921 = vmatprep.subr.bf16.mxu1 %v3150_v2 }
 0xb6e   : > { %2922 = vmatpush3.bf16.msra.mxu1 %v3031_v1 }
 0xb6f   : > { %2923 = vmatprep.subr.bf16.mxu1 %v3150_v2 }
 0xb72   : > { %2924 = vmatpush3.bf16.msra.mxu1 %v3032_v12 }
 0xb73   : > { %2925 = vmatprep.subr.bf16.mxu1 %v3150_v2 }
 0xb76   : > { %2926 = vmatpush3.bf16.msra.mxu1 %v3033_v13 }
 0xc29   : > { %v2080_v46 = vpop.f32.mrf.mxu1 }
 0xc2a   : > { %v2086_v47 = vadd.f32 %v2080_v46, %v3561_v59  ;;  %v3029_v59 = vld [vmem:[%s3354_s23] sm:$0xff]   ;;  %v2287_v46 = vrot.slane %v3589_v44, %v2286_v43 }
 0xc2b   : > { %v2909_v48 = vpop.f32.mrf.mxu1  ;;  %2914 = vmatpush3.bf16.msra.mxu0 %v3029_v59 }
 0xc2c   : > { %v2091_v49 = vadd.f32 %v2090_v45, %v2086_v47  ;;  %v2291_v45 = vsub.s32 5, %v3585_v42 }
 0xc2d   : > { %v2083_v50 = vpop.f32.mrf.mxu1 }
 0xc2e   : > { %v2092_v52 = vadd.f32 %v2091_v49, %v3384_v6  ;;  %v2292_v48 = vrot.slane %v3589_v44, %v2291_v45 }
 0xc2f   : > { %v2910_v53 = vpop.f32.mrf.mxu1 }
 0xc30   : > { %v2093_v54 = vsel %vm699_vm2, %v2092_v52, 0.0 }
 0xc31   : > { %2094 = vadd.xlane.f32.xlu0 %v2093_v54 }
 0xcba   : > { %v2095_v55 = vpop.xlane.xlu0 %2094 }
 0xcbb   : > { %v2097_v56 = vmul.f32 0.03125, %v2095_v55 }
 0xcbd   : > { %v2098_v57 = vsub.f32 %v2092_v52, %v2097_v56 }
 0xcbf   : > { %v2099_v58 = vmul.f32 %v2098_v57, %v2098_v57 }
 0xcc1   : > { %v2100_v60 = vsel %vm699_vm2, %v2099_v58, 0.0 }
 0xcc2   : > { %2101 = vadd.xlane.f32.xlu1 %v2100_v60 }
 0xd4b   : > { %v2102_v62 = vpop.xlane.xlu1 %2101 }
 0xd4c   : > { %v2103_v6 = vmul.f32 0.03125, %v2102_v62 }
 0xd4e   : > { %v2104_v63 = vadd.f32 1e-12, %v2103_v6 }
 0xd50   : > { %3050 = vrsqrt.f32 %v2104_v63 }
 0xd5d   : > { %v3051_v5 = vpop.eup %3050 }
 0xd5e   : > { %v2106_v8 = vmul.f32 %v3051_v5, %v2098_v57 }
 0xd60   : > { %v2111_v7 = vmul.f32 %v2110_v4, %v2106_v8 }
 0xd62   : > { %v2116_v10 = vadd.f32 %v2115_v9, %v2111_v7 }
 0xd64   : > { %v2117_v11 = vpack.c.bf16 %v2116_v10, %v2116_v10 }
 0xd66   : > { %2916 = vmatmul.mubr.msk.bf16.vlgmr.msra.gmra.mxu0 %vm699_vm2, %v2117_v11 }
 0xe26   : > { %v2178_v15 = vpop.f32.mrf.mxu0 }
 0xe27   : > { %v2179_v16 = vadd.f32 %v2655_v14, %v2178_v15 }
 0xe28   : > { %v2917_v17 = vpop.f32.mrf.mxu0 }
 0xe29   : > { %v2185_v18 = vmul.f32 0.70710677, %v2179_v16  ;;  %v2184_v22 = vmul.f32 0.5, %v2179_v16 }
 0xe2a   : > { %v2181_v19 = vpop.f32.mrf.mxu0 }
 0xe2b   : > { %3052 = verf.f32 %v2185_v18 }
 0xe2c   : > { %v2918_v20 = vpop.f32.mrf.mxu0 }
 0xe38   : > { %v3053_v21 = vpop.eup %3052 }
 0xe39   : > { %v2187_v23 = vadd.f32 1.0, %v3053_v21 }
 0xe3b   : > { %v2188_v24 = vmul.f32 %v2187_v23, %v2184_v22 }
 0xe3d   : > { %v2189_v2 = vpack.c.bf16 %v2188_v24, %v2188_v24 }
 0xe3f   : > { %2928 = vmatmul.mubr.msk.bf16.vlgmr.msra.gmra.mxu1 %vm2226_vm5, %v2189_v2 }
 0xeff   : > { %v2264_v27 = vpop.f32.mrf.mxu1 }
 0xf00   : > { %v2265_v28 = vadd.f32 %v2264_v27, %v2201_v26 }
 0xf01   : > { %v2929_v29 = vpop.f32.mrf.mxu1 }
 0xf02   : > { %v2270_v30 = vadd.f32 %v2265_v28, %v2116_v10 }
 0xf03   : > { %v2267_v31 = vpop.f32.mrf.mxu1 }
 0xf04   : > { %v2271_v32 = vsel %vm699_vm2, %v2270_v30, 0.0 }
 0xf05   : > { %2272 = vadd.xlane.f32.xlu0 %v2271_v32  ;;  %v2930_v33 = vpop.f32.mrf.mxu1 }
 0xf8e   : > { %v2273_v34 = vpop.xlane.xlu0 %2272 }
 0xf8f   : > { %v2274_v35 = vmul.f32 0.03125, %v2273_v34 }
 0xf91   : > { %v2275_v36 = vsub.f32 %v2270_v30, %v2274_v35 }
 0xf93   : > { %v2276_v37 = vmul.f32 %v2275_v36, %v2275_v36 }
 0xf95   : > { %v2277_v38 = vsel %vm699_vm2, %v2276_v37, 0.0 }
 0xf96   : > { %2278 = vadd.xlane.f32.xlu1 %v2277_v38 }
0x101f   : > { %v2279_v39 = vpop.xlane.xlu1 %2278 }
0x1020   : > { %v2280_v40 = vmul.f32 0.03125, %v2279_v39 }
0x1022   : > { %v2281_v41 = vadd.f32 1e-12, %v2280_v40 }
0x1024   : > { %3054 = vrsqrt.f32 %v2281_v41 }
0x1031   : > { %v3055_v47 = vpop.eup %3054 }
0x1032   : > { %v2283_v49 = vmul.f32 %v3055_v47, %v2275_v36 }
0x1034   : > { %v2288_v50 = vmul.f32 %v2287_v46, %v2283_v49  ;;  %2298 = sbr.rel (%p2664_p1) target bundleno = 4154 (0x103a), region = 80 }
0x1036   : > { %v2293_v52 = vadd.f32 %v2292_v48, %v2288_v50 }
0x1038   : > { %2294 = vst.msk [vmem:[#allocation2] sm:$0xff] %vm699_vm2, %v2293_v52 }
0x1039   : > { %2299 = vst.msk [vmem:[%s607_s8] sm:$0xff] %vm699_vm2, %v2293_v52 }
0x103a PF: > { %s3744_s27 = sld [smem:[#allocation10_spill]]  ;;  %s2314_s16 = sshll.u32 %s607_s8, 4  ;;  %s2315_s16 = int_to_ptr.vmem [resolvable:$true] %s2314_s16 }
0x103b   : > { %s3745_s29 = sld [smem:[#allocation7_spill]]  ;;  %s3056_s15 = scalar_lea.vmem %s2315_s16, 128 }
0x103c   : > { %s3747_s20 = sld [smem:[#allocation28_spill]]  ;;  %p3057_p2 = scmp.ne.s32.totalorder %s2315_s16, %s3056_s15 }
0x103d   : > { %s3152_s2 = smov [#allocation3]  }
0x103e   : > { %p3058_p4 = pnand %p3057_p2, %p3272_p3  ;;  %s3060_s24 = sshll.u32 %s3152_s2, 4  ;;  %s3061_s24 = int_to_ptr.vmem [resolvable:$false] %s3060_s24 }
0x103f   : > { %s3062_s26 = scalar_lea.vmem %s3061_s24, 256  ;;  %p3063_p6 = scmp.lt.s32.totalorder %s2315_s16, %s3061_s24 }
0x1040   : > { %s2666_s18 = sshll.u32 %s3744_s27, 7  ;;  %p3059_p5 = pneg %p3058_p4 }
0x1041   : > { %s3748_s23 = sand.u32 1, %s3745_s29   ;;  %p3064_p7 = scmp.lt.s32.totalorder %s3062_s26, %s3056_s15 }
0x1042   : > { %s2312_s14 = scalar_lea.hbm %s3747_s20, %s2666_s18  ;;  %s2301_s25 = scalar_lea.sflag [#allocation4], %s3748_s23 }
0x1043   : > { %p3065_p8 = por %p3064_p7, %p3063_p6 }
0x1045   : > { %p3066_p10 = pnand %p3065_p8, %p3059_p5 }
0x1047   : > { %3069 = shalt.err (!%p3066_p10)
}
0x1048   : > { %s3070_s28 = scalar_lea.hbm %s2312_s14, 128  ;;  %s3074_s21 = scalar_lea.hbm %s3747_s20, 256 }
0x1049   : > { %p3071_p11 = scmp.ne.s32.totalorder %s2312_s14, %s3070_s28  ;;  %p3075_p0 = scmp.lt.s32.totalorder %s2312_s14, %s3747_s20 }
0x104a   : > { %p3076_p1 = scmp.lt.s32.totalorder %s3074_s21, %s3070_s28 }
0x104b   : > { %p3072_p12 = pnand %p3071_p11, %p3272_p3 }
0x104c   : > { %p3077_p2 = por %p3076_p1, %p3075_p0 }
0x104d   : > { %p3073_p13 = pneg %p3072_p12 }
0x104f   : > { %p3078_p4 = pnand %p3077_p2, %p3073_p13 }
0x1051   : > { %3081 = shalt.err (!%p3078_p4)
}
0x1052   : > { %2931 = dma.vmem_to_hbm [thread:$0]  (%p3272_p3), %s2315_s16, 128, %s2312_s14, %s2301_s25  }
0x1053 PF: > { %s3749_s3 = sld [smem:[#allocation13_spill]] }
0x1054   : > { %s3750_s5 = sld [smem:[#allocation6_spill]] }
0x1059   : > { %p2937_p5 = scmp.ge.s32.totalorder %s3749_s3, 2 }
0x105a   : > { %s2326_s0 = sand.u32 1, %s3750_s5  }
0x105b   : > { %p2934_p6 = pnand %p2937_p5, %p3282_p9  ;;  %s2327_s13 = scalar_lea.sflag [#allocation4], %s2326_s0 }
0x105d   : > { %p2935_p7 = pneg %p2934_p6 }
0x105f   : > { %3115 = dma.done.wait (%p2935_p7), %s2327_s13, 128  }
0x1060   : > { %3117 = vsyncadd (%p2935_p7), %s2327_s13, 4294967168  ;;  %s26_s15 = sadd.s32 1, %s3749_s3   ;;  %s3752_s25 = sld [smem:[#allocation7_spill]] }
0x1061   : > { %p23_p8 = scmp.ge.s32.totalorder %s26_s15, 6   ;;  %s3753_s26 = sld [smem:[#allocation8_spill]] }
0x1062   : > { %s3754_s27 = sld [smem:[#allocation18_spill]] }
0x1063   : > { %s3755_s28 = sld [smem:[#allocation11_spill]]  ;;  %25 = sbr.rel (!%p23_p8) target bundleno = 16 (0x10), region = 172 }
0x1064   : > { %s3756_s29 = sld [smem:[#allocation12_spill]] }
0x1065   : > { %s3757_s30 = sld [smem:[#allocation14_spill]] }
0x1066   : > { %s3758_s14 = sld [smem:[#allocation16_spill]] }
0x1068   :  { %2332 = vsyncpa [#allocation4], 1 }
0x1069   :  { %2334 = vsyncpa [#allocation4 + $0x1], 1 }

</bundles_post_ra>
